<compile_context>
chip_gen: v5e
topology: v5e:2x2
jax: 0.10.0
libtpu: 0.0.40
codegen_flags: <defaults>
</compile_context>

<pallas_src>
import jax
import jax.numpy as jnp
import numpy as np
from jax.experimental import pallas as pl
from jax.experimental.pallas import tpu as pltpu

Y_CORRECTION = 1.5 / 0.9096226349071285
SQUISH_RANGE = (0.75, 1.0 / 0.75)
MAX_ANGLE = 0.3
MAX_SHIFT = 0.005


# -----------------------------------------------------------------------------
# Pallas kernel
# -----------------------------------------------------------------------------
def _augment_kernel(flip_ref, x_ref, noise_ref, m_ref, perm_ref, o_ref):
    """Augment a sub-batch of samples.

    flip_ref:  (B,) int32 in SMEM (scalar prefetch) — per-sample flip bit.
    x_ref:     (Bb, A, P, T) raw coordinates (0 == missing / "nan").
    noise_ref: (Bb, A, P, 1) point-shift noise, post-scaled (and for flipped
               samples inverse-permuted) in the wrapper.
    m_ref:     (Bb, A, A) combined per-sample axis transform
               M = diag(post) @ R @ diag(squish * flip_sign * y_corr).
    perm_ref:  (P, P) shared reflection one-hot (left-multiply); fetched once.
    o_ref:     (Bb, A, P, T) output (f32).
    """
    block_b, A, P, T = x_ref.shape
    perm = perm_ref[...]                               # (P, P), resident
    b0 = pl.program_id(0) * block_b

    for bb in range(block_b):                          # static unroll (small)
        flip = flip_ref[b0 + bb] != 0                  # scalar from SMEM

        x = x_ref[bb].astype(jnp.float32)              # (A, P, T), cast in-kernel
        w = jnp.where(x == 0.0, 0.0, 1.0)              # validity = 1 - is_nan

        # masked mean over (P, T): w*x and w reduced in one stacked pass
        st = jnp.concatenate([w * x, w], axis=0)       # (2A, P, T)
        st = jnp.sum(st, axis=1, keepdims=True)        # (2A, 1, T)
        st = jnp.sum(st, axis=2, keepdims=True)        # (2A, 1, 1)
        mean = st[:A] / (st[A:] + 1e-5)
        xc = x - mean                                  # centered coords

        m_b = m_ref[bb]                                # (A, A)
        nz = noise_ref[bb]                             # (A, P, 1)

        rows = []
        for i in range(A):
            if A >= 2 and i < 2:                       # rotation mixes axes 0,1 only
                acc = m_b[i:i + 1, 0:1] * xc[0] + m_b[i:i + 1, 1:2] * xc[1]
            else:                                      # axes >= 2: diagonal scale
                acc = m_b[i:i + 1, i:i + 1] * xc[i]
            # noise broadcasts over T (lanes); mask with the un-permuted mask —
            # the reflection is applied afterwards to the finished row.
            rows.append(((acc + nz[i]) * w[i]).astype(o_ref.dtype))  # (P, T)

        @pl.when(flip)
        def _store_flipped():
            for i in range(A):
                o_ref[bb, i] = jnp.dot(
                    perm, rows[i], preferred_element_type=jnp.float32
                ).astype(o_ref.dtype)

        @pl.when(jnp.logical_not(flip))
        def _store_identity():
            for i in range(A):
                o_ref[bb, i] = rows[i]


# -----------------------------------------------------------------------------
# Wrapper (parameter folding + pallas_call)
# -----------------------------------------------------------------------------
def make_aug_params(key, batch, num_points, num_axes):
    """Draw the augmentation randoms exactly as the torch forward does."""
    kp, kf, ka, ks = jax.random.split(key, 4)
    p = jax.random.randint(kp, (batch,), 0, 2)                                # flip bit
    fac = SQUISH_RANGE[0] + jax.random.uniform(kf, (batch, num_axes)) * (
        SQUISH_RANGE[1] - SQUISH_RANGE[0])                                    # squish
    ang = 2.0 * (jax.random.uniform(ka, (batch,)) - 0.5) * MAX_ANGLE          # rotate
    shift = 2.0 * (jax.random.uniform(ks, (batch, num_points, num_axes)) - 0.5
                   ) * MAX_SHIFT                                              # point shift
    return p, fac, ang, shift


def augment_x_pallas(x, p, fac, ang, shift, reflect_arr, block_b=4):
    """x: (B, T, P, A); returns augmented (B, T, P, A) float32."""
    B, T, P, A = x.shape

    # samples per grid step: largest divisor of B not exceeding block_b
    sub_b = 1
    for cand in range(min(block_b, B), 0, -1):
        if B % cand == 0:
            sub_b = cand
            break

    # ---- fold the augmentation randoms into tiny per-sample parameters ----
    sign = (1 - 2 * p).astype(jnp.float32)                   # +1 keep / -1 flip x-axis
    pre = fac.astype(jnp.float32)
    pre = pre.at[:, 0].multiply(sign).at[:, 1].multiply(Y_CORRECTION)
    c, s = jnp.cos(ang).astype(jnp.float32), jnp.sin(ang).astype(jnp.float32)
    R = jnp.broadcast_to(jnp.eye(A, dtype=jnp.float32), (B, A, A))
    R = R.at[:, 0, 0].set(c).at[:, 0, 1].set(s).at[:, 1, 0].set(-s).at[:, 1, 1].set(c)
    post = jnp.ones((A,), jnp.float32).at[1].set(1.0 / Y_CORRECTION)
    M = post[None, :, None] * (R * pre[:, None, :])           # (B, A, A)

    # point-shift noise, pre-scaled by `post`; for flipped samples it is
    # inverse-permuted here so the kernel applies the reflection exactly once,
    # to the finished row, instead of permuting x and the mask separately.
    noise = shift.astype(jnp.float32) * post[None, None, :]   # (B, P, A)
    noise_k = jnp.transpose(noise, (0, 2, 1))                 # (B, A, P)
    inv_reflect = jnp.argsort(reflect_arr)
    noise_eff = jnp.where((p == 1)[:, None, None],
                          noise_k[:, :, inv_reflect], noise_k)
    noise_eff = noise_eff[..., None]                          # (B, A, P, 1)

    # one shared reflection matrix (left-multiply): (perm @ z)[p] = z[reflect[p]]
    perm = jax.nn.one_hot(reflect_arr, P, dtype=jnp.float32)  # (P, P)

    flip = p.astype(jnp.int32)                                # SMEM scalars

    # (B, T, P, A) -> (B, A, P, T): frames on the lane axis; f32 cast happens
    # inside the kernel.
    # TODO(synk): if the consumer can take (B, A, P, T) directly, drop both
    # HBM transposes around the pallas_call.
    x_k = jnp.transpose(x, (0, 3, 2, 1))

    grid_spec = pltpu.PrefetchScalarGridSpec(
        num_scalar_prefetch=1,
        grid=(B // sub_b,),
        in_specs=[
            pl.BlockSpec((sub_b, A, P, T), lambda b, flip_ref: (b, 0, 0, 0)),
            pl.BlockSpec((sub_b, A, P, 1), lambda b, flip_ref: (b, 0, 0, 0)),
            pl.BlockSpec((sub_b, A, A), lambda b, flip_ref: (b, 0, 0)),
            pl.BlockSpec((P, P), lambda b, flip_ref: (0, 0)),   # resident, one DMA
        ],
        out_specs=pl.BlockSpec((sub_b, A, P, T), lambda b, flip_ref: (b, 0, 0, 0)),
    )

    out_k = pl.pallas_call(
        _augment_kernel,
        out_shape=jax.ShapeDtypeStruct((B, A, P, T), jnp.float32),
        grid_spec=grid_spec,
        compiler_params=pltpu.CompilerParams(dimension_semantics=("parallel",)),
    )(flip, x_k, noise_eff, M, perm)

    return jnp.transpose(out_k, (0, 3, 2, 1))                 # back to (B, T, P, A)


# -----------------------------------------------------------------------------
# Pure-JAX reference (mirrors the torch forward op-by-op, same randoms)
# -----------------------------------------------------------------------------
def augment_x_ref(x, p, fac, ang, shift, reflect_arr):
    x = x.astype(jnp.float32)
    is_nan = (x == 0).astype(jnp.float32)
    w = 1.0 - is_nan
    mean = jnp.sum(w * x, axis=(1, 2), keepdims=True) / (
        jnp.sum(w, axis=(1, 2), keepdims=True) + 1e-5)
    x = x - mean
    x = x.at[..., 1].multiply(Y_CORRECTION)
    sign = (1 - 2 * p).astype(jnp.float32)
    x = x.at[..., 0].multiply(sign[:, None, None])
    flip = (p == 1)[:, None, None, None]
    x = jnp.where(flip, x[:, :, reflect_arr, :], x)
    is_nan = jnp.where(flip, is_nan[:, :, reflect_arr, :], is_nan)
    x = x * fac[:, None, None, :].astype(jnp.float32)
    c, s = jnp.cos(ang), jnp.sin(ang)
    x0, x1 = x[..., 0], x[..., 1]
    n0 = c[:, None, None] * x0 + s[:, None, None] * x1
    n1 = -s[:, None, None] * x0 + c[:, None, None] * x1
    x = x.at[..., 0].set(n0).at[..., 1].set(n1)
    x = x + shift[:, None, :, :].astype(jnp.float32)
    x = x.at[..., 1].divide(Y_CORRECTION)
    x = x * (1.0 - is_nan)
    return x


# -----------------------------------------------------------------------------
if __name__ == "__main__":
    B, T, P, A = 8, 128, 16, 3  # batch, frames (lane axis), landmark points, axes

    # TODO(synk): FeatureGenerator's real reflect_arr / anc_matrix / line tables
    # are not available; forward() only needs reflect_arr, synthesized here as a
    # deterministic involution (point-order reversal).
    reflect_arr = jnp.arange(P - 1, -1, -1, dtype=jnp.int32)

    key = jax.random.PRNGKey(0)
    kx, kz, kaug = jax.random.split(key, 3)
    x = jax.random.normal(kx, (B, T, P, A), dtype=jnp.float32)
    # mark ~20% of landmarks as missing (encoded as exact 0, like the module)
    missing = jax.random.bernoulli(kz, 0.2, (B, T, P, 1))
    x = jnp.where(missing, 0.0, x)

    p, fac, ang, shift = make_aug_params(kaug, B, P, A)

    out = augment_x_pallas(x, p, fac, ang, shift, reflect_arr)
    out = jax.block_until_ready(out)

    ref = augment_x_ref(x, p, fac, ang, shift, reflect_arr)
    np.testing.assert_allclose(np.asarray(out), np.asarray(ref),
                               rtol=1e-4, atol=1e-4)
    print("KERNEL_OK")
</pallas_src>

<mosaic_0001>
module attributes {stable_mosaic.version = 11 : i64} {
  func.func @_augment_kernel(%arg0: i32, %arg1: memref<8xi32, #tpu.memory_space<smem>>, %arg2: memref<4x3x16x128xf32, #tpu.memory_space<vmem>>, %arg3: memref<4x3x16x1xf32, #tpu.memory_space<vmem>>, %arg4: memref<4x3x3xf32, #tpu.memory_space<vmem>>, %arg5: memref<16x16xf32, #tpu.memory_space<vmem>>, %arg6: memref<4x3x16x128xf32, #tpu.memory_space<vmem>>) attributes {dimension_semantics = [#tpu.dimension_semantics<parallel>], iteration_bounds = array<i64: 2>, scalar_prefetch = 1 : i64, scratch_operands = 0 : i64, tpu.core_type = #tpu.core_type<tc>, window_params = [{transform_indices = @transform_0, window_bounds = array<i64: 4, 3, 16, 128>}, {transform_indices = @transform_1, window_bounds = array<i64: 4, 3, 16, 1>}, {transform_indices = @transform_2, window_bounds = array<i64: 4, 3, 3>}, {pipeline_mode = #tpu.pipeline_mode<synchronous>, transform_indices = @transform_3, window_bounds = array<i64: 16, 16>}, {transform_indices = @transform_4, window_bounds = array<i64: 4, 3, 16, 128>}]} {
    %c0 = arith.constant 0 : index
    %c0_0 = arith.constant 0 : index
    %0 = vector.load %arg5[%c0, %c0_0] : memref<16x16xf32, #tpu.memory_space<vmem>>, vector<16x16xf32>
    %c4_i32 = arith.constant 4 : i32
    %1 = arith.muli %arg0, %c4_i32 : i32
    %c0_i32 = arith.constant 0 : i32
    %2 = arith.addi %1, %c0_i32 : i32
    %3 = arith.index_cast %2 : i32 to index
    %4 = memref.load %arg1[%3] : memref<8xi32, #tpu.memory_space<smem>>
    %c0_i32_1 = arith.constant 0 : i32
    %5 = arith.cmpi ne, %4, %c0_i32_1 : i32
    %c0_2 = arith.constant 0 : index
    %c0_3 = arith.constant 0 : index
    %c0_4 = arith.constant 0 : index
    %c0_5 = arith.constant 0 : index
    %6 = vector.load %arg2[%c0_2, %c0_3, %c0_4, %c0_5] : memref<4x3x16x128xf32, #tpu.memory_space<vmem>>, vector<1x3x16x128xf32>
    %7 = vector.shape_cast %6 : vector<1x3x16x128xf32> to vector<3x16x128xf32>
    %cst = arith.constant 0.000000e+00 : f32
    %8 = vector.broadcast %cst : f32 to vector<3x16x128xf32>
    %9 = arith.cmpf oeq, %7, %8 : vector<3x16x128xf32>
    %cst_6 = arith.constant 0.000000e+00 : f32
    %cst_7 = arith.constant 1.000000e+00 : f32
    %10 = vector.broadcast %cst_6 : f32 to vector<3x16x128xf32>
    %11 = vector.broadcast %cst_7 : f32 to vector<3x16x128xf32>
    %12 = arith.select %9, %10, %11 : vector<3x16x128xi1>, vector<3x16x128xf32>
    %13 = arith.mulf %12, %7 : vector<3x16x128xf32>
    %14 = tpu.concatenate %13, %12 in 0 : vector<3x16x128xf32>, vector<3x16x128xf32> -> vector<6x16x128xf32>
    %cst_8 = arith.constant dense<0.000000e+00> : vector<6x128xf32>
    %15 = vector.multi_reduction <add>, %14, %cst_8 [1] : vector<6x16x128xf32> to vector<6x128xf32>
    %16 = vector.shape_cast %15 : vector<6x128xf32> to vector<6x1x128xf32>
    %cst_9 = arith.constant dense<0.000000e+00> : vector<6x1xf32>
    %17 = vector.multi_reduction <add>, %16, %cst_9 [2] : vector<6x1x128xf32> to vector<6x1xf32>
    %18 = vector.shape_cast %17 : vector<6x1xf32> to vector<6x1x1xf32>
    %19 = vector.extract_strided_slice %18 {offsets = [0, 0, 0], sizes = [3, 1, 1], strides = [1, 1, 1]} : vector<6x1x1xf32> to vector<3x1x1xf32>
    %20 = vector.extract_strided_slice %18 {offsets = [3, 0, 0], sizes = [3, 1, 1], strides = [1, 1, 1]} : vector<6x1x1xf32> to vector<3x1x1xf32>
    %cst_10 = arith.constant 9.99999974E-6 : f32
    %21 = vector.broadcast %cst_10 : f32 to vector<3x1x1xf32>
    %22 = arith.addf %20, %21 : vector<3x1x1xf32>
    %23 = arith.divf %19, %22 : vector<3x1x1xf32>
    %24 = vector.broadcast %23 : vector<3x1x1xf32> to vector<3x16x128xf32>
    %25 = arith.subf %7, %24 : vector<3x16x128xf32>
    %c0_11 = arith.constant 0 : index
    %c0_12 = arith.constant 0 : index
    %c0_13 = arith.constant 0 : index
    %26 = vector.load %arg4[%c0_11, %c0_12, %c0_13] : memref<4x3x3xf32, #tpu.memory_space<vmem>>, vector<1x3x3xf32>
    %27 = vector.shape_cast %26 : vector<1x3x3xf32> to vector<3x3xf32>
    %c0_14 = arith.constant 0 : index
    %c0_15 = arith.constant 0 : index
    %c0_16 = arith.constant 0 : index
    %c0_17 = arith.constant 0 : index
    %28 = vector.load %arg3[%c0_14, %c0_15, %c0_16, %c0_17] : memref<4x3x16x1xf32, #tpu.memory_space<vmem>>, vector<1x3x16x1xf32>
    %29 = vector.shape_cast %28 : vector<1x3x16x1xf32> to vector<3x16x1xf32>
    %30 = vector.extract_strided_slice %27 {offsets = [0, 0], sizes = [1, 1], strides = [1, 1]} : vector<3x3xf32> to vector<1x1xf32>
    %31 = vector.extract_strided_slice %25 {offsets = [0, 0, 0], sizes = [1, 16, 128], strides = [1, 1, 1]} : vector<3x16x128xf32> to vector<1x16x128xf32>
    %32 = vector.shape_cast %31 : vector<1x16x128xf32> to vector<16x128xf32>
    %33 = vector.broadcast %30 : vector<1x1xf32> to vector<16x128xf32>
    %34 = arith.mulf %33, %32 : vector<16x128xf32>
    %35 = vector.extract_strided_slice %27 {offsets = [0, 1], sizes = [1, 1], strides = [1, 1]} : vector<3x3xf32> to vector<1x1xf32>
    %36 = vector.extract_strided_slice %25 {offsets = [1, 0, 0], sizes = [1, 16, 128], strides = [1, 1, 1]} : vector<3x16x128xf32> to vector<1x16x128xf32>
    %37 = vector.shape_cast %36 : vector<1x16x128xf32> to vector<16x128xf32>
    %38 = vector.broadcast %35 : vector<1x1xf32> to vector<16x128xf32>
    %39 = arith.mulf %38, %37 : vector<16x128xf32>
    %40 = arith.addf %34, %39 : vector<16x128xf32>
    %41 = vector.extract_strided_slice %29 {offsets = [0, 0, 0], sizes = [1, 16, 1], strides = [1, 1, 1]} : vector<3x16x1xf32> to vector<1x16x1xf32>
    %42 = vector.shape_cast %41 : vector<1x16x1xf32> to vector<16x1xf32>
    %43 = vector.broadcast %42 : vector<16x1xf32> to vector<16x128xf32>
    %44 = arith.addf %40, %43 : vector<16x128xf32>
    %45 = vector.extract_strided_slice %12 {offsets = [0, 0, 0], sizes = [1, 16, 128], strides = [1, 1, 1]} : vector<3x16x128xf32> to vector<1x16x128xf32>
    %46 = vector.shape_cast %45 : vector<1x16x128xf32> to vector<16x128xf32>
    %47 = arith.mulf %44, %46 : vector<16x128xf32>
    %48 = vector.extract_strided_slice %27 {offsets = [1, 0], sizes = [1, 1], strides = [1, 1]} : vector<3x3xf32> to vector<1x1xf32>
    %49 = vector.extract_strided_slice %25 {offsets = [0, 0, 0], sizes = [1, 16, 128], strides = [1, 1, 1]} : vector<3x16x128xf32> to vector<1x16x128xf32>
    %50 = vector.shape_cast %49 : vector<1x16x128xf32> to vector<16x128xf32>
    %51 = vector.broadcast %48 : vector<1x1xf32> to vector<16x128xf32>
    %52 = arith.mulf %51, %50 : vector<16x128xf32>
    %53 = vector.extract_strided_slice %27 {offsets = [1, 1], sizes = [1, 1], strides = [1, 1]} : vector<3x3xf32> to vector<1x1xf32>
    %54 = vector.extract_strided_slice %25 {offsets = [1, 0, 0], sizes = [1, 16, 128], strides = [1, 1, 1]} : vector<3x16x128xf32> to vector<1x16x128xf32>
    %55 = vector.shape_cast %54 : vector<1x16x128xf32> to vector<16x128xf32>
    %56 = vector.broadcast %53 : vector<1x1xf32> to vector<16x128xf32>
    %57 = arith.mulf %56, %55 : vector<16x128xf32>
    %58 = arith.addf %52, %57 : vector<16x128xf32>
    %59 = vector.extract_strided_slice %29 {offsets = [1, 0, 0], sizes = [1, 16, 1], strides = [1, 1, 1]} : vector<3x16x1xf32> to vector<1x16x1xf32>
    %60 = vector.shape_cast %59 : vector<1x16x1xf32> to vector<16x1xf32>
    %61 = vector.broadcast %60 : vector<16x1xf32> to vector<16x128xf32>
    %62 = arith.addf %58, %61 : vector<16x128xf32>
    %63 = vector.extract_strided_slice %12 {offsets = [1, 0, 0], sizes = [1, 16, 128], strides = [1, 1, 1]} : vector<3x16x128xf32> to vector<1x16x128xf32>
    %64 = vector.shape_cast %63 : vector<1x16x128xf32> to vector<16x128xf32>
    %65 = arith.mulf %62, %64 : vector<16x128xf32>
    %66 = vector.extract_strided_slice %27 {offsets = [2, 2], sizes = [1, 1], strides = [1, 1]} : vector<3x3xf32> to vector<1x1xf32>
    %67 = vector.extract_strided_slice %25 {offsets = [2, 0, 0], sizes = [1, 16, 128], strides = [1, 1, 1]} : vector<3x16x128xf32> to vector<1x16x128xf32>
    %68 = vector.shape_cast %67 : vector<1x16x128xf32> to vector<16x128xf32>
    %69 = vector.broadcast %66 : vector<1x1xf32> to vector<16x128xf32>
    %70 = arith.mulf %69, %68 : vector<16x128xf32>
    %71 = vector.extract_strided_slice %29 {offsets = [2, 0, 0], sizes = [1, 16, 1], strides = [1, 1, 1]} : vector<3x16x1xf32> to vector<1x16x1xf32>
    %72 = vector.shape_cast %71 : vector<1x16x1xf32> to vector<16x1xf32>
    %73 = vector.broadcast %72 : vector<16x1xf32> to vector<16x128xf32>
    %74 = arith.addf %70, %73 : vector<16x128xf32>
    %75 = vector.extract_strided_slice %12 {offsets = [2, 0, 0], sizes = [1, 16, 128], strides = [1, 1, 1]} : vector<3x16x128xf32> to vector<1x16x128xf32>
    %76 = vector.shape_cast %75 : vector<1x16x128xf32> to vector<16x128xf32>
    %77 = arith.mulf %74, %76 : vector<16x128xf32>
    %78 = arith.extui %5 : i1 to i32
    %c0_i32_18 = arith.constant 0 : i32
    %79 = arith.cmpi ne, %78, %c0_i32_18 : i32
    scf.if %79 {
      %cst_80 = arith.constant dense<0.000000e+00> : vector<16x128xf32>
      %326 = tpu.matmul %0, %47, %cst_80 {dimension_numbers = #tpu.dot_dimension_numbers<[1], [0], [0], [1], [0, 0, 1, 1], [], []>} : vector<16x16xf32>, vector<16x128xf32>, vector<16x128xf32> -> vector<16x128xf32>
      %c0_81 = arith.constant 0 : index
      %c0_82 = arith.constant 0 : index
      %c0_83 = arith.constant 0 : index
      %c0_84 = arith.constant 0 : index
      %327 = vector.load %arg6[%c0_81, %c0_82, %c0_83, %c0_84] : memref<4x3x16x128xf32, #tpu.memory_space<vmem>>, vector<1x1x16x128xf32>
      %328 = vector.shape_cast %327 : vector<1x1x16x128xf32> to vector<16x128xf32>
      %329 = vector.shape_cast %326 : vector<16x128xf32> to vector<1x1x16x128xf32>
      tpu.vector_store %arg6[%c0_81, %c0_82, %c0_83, %c0_84], %329 {strides = array<i32>} : memref<4x3x16x128xf32, #tpu.memory_space<vmem>>, vector<1x1x16x128xf32>,
      %cst_85 = arith.constant dense<0.000000e+00> : vector<16x128xf32>
      %330 = tpu.matmul %0, %65, %cst_85 {dimension_numbers = #tpu.dot_dimension_numbers<[1], [0], [0], [1], [0, 0, 1, 1], [], []>} : vector<16x16xf32>, vector<16x128xf32>, vector<16x128xf32> -> vector<16x128xf32>
      %c0_86 = arith.constant 0 : index
      %c1_87 = arith.constant 1 : index
      %c0_88 = arith.constant 0 : index
      %c0_89 = arith.constant 0 : index
      %331 = vector.load %arg6[%c0_86, %c1_87, %c0_88, %c0_89] : memref<4x3x16x128xf32, #tpu.memory_space<vmem>>, vector<1x1x16x128xf32>
      %332 = vector.shape_cast %331 : vector<1x1x16x128xf32> to vector<16x128xf32>
      %333 = vector.shape_cast %330 : vector<16x128xf32> to vector<1x1x16x128xf32>
      tpu.vector_store %arg6[%c0_86, %c1_87, %c0_88, %c0_89], %333 {strides = array<i32>} : memref<4x3x16x128xf32, #tpu.memory_space<vmem>>, vector<1x1x16x128xf32>,
      %cst_90 = arith.constant dense<0.000000e+00> : vector<16x128xf32>
      %334 = tpu.matmul %0, %77, %cst_90 {dimension_numbers = #tpu.dot_dimension_numbers<[1], [0], [0], [1], [0, 0, 1, 1], [], []>} : vector<16x16xf32>, vector<16x128xf32>, vector<16x128xf32> -> vector<16x128xf32>
      %c0_91 = arith.constant 0 : index
      %c2_92 = arith.constant 2 : index
      %c0_93 = arith.constant 0 : index
      %c0_94 = arith.constant 0 : index
      %335 = vector.load %arg6[%c0_91, %c2_92, %c0_93, %c0_94] : memref<4x3x16x128xf32, #tpu.memory_space<vmem>>, vector<1x1x16x128xf32>
      %336 = vector.shape_cast %335 : vector<1x1x16x128xf32> to vector<16x128xf32>
      %337 = vector.shape_cast %334 : vector<16x128xf32> to vector<1x1x16x128xf32>
      tpu.vector_store %arg6[%c0_91, %c2_92, %c0_93, %c0_94], %337 {strides = array<i32>} : memref<4x3x16x128xf32, #tpu.memory_space<vmem>>, vector<1x1x16x128xf32>,
    } else {
    }
    %true = arith.constant true
    %80 = arith.xori %5, %true : i1
    %81 = arith.extui %80 : i1 to i32
    %c0_i32_19 = arith.constant 0 : i32
    %82 = arith.cmpi ne, %81, %c0_i32_19 : i32
    scf.if %82 {
      %c0_80 = arith.constant 0 : index
      %c0_81 = arith.constant 0 : index
      %c0_82 = arith.constant 0 : index
      %c0_83 = arith.constant 0 : index
      %326 = vector.load %arg6[%c0_80, %c0_81, %c0_82, %c0_83] : memref<4x3x16x128xf32, #tpu.memory_space<vmem>>, vector<1x1x16x128xf32>
      %327 = vector.shape_cast %326 : vector<1x1x16x128xf32> to vector<16x128xf32>
      %328 = vector.shape_cast %47 : vector<16x128xf32> to vector<1x1x16x128xf32>
      tpu.vector_store %arg6[%c0_80, %c0_81, %c0_82, %c0_83], %328 {strides = array<i32>} : memref<4x3x16x128xf32, #tpu.memory_space<vmem>>, vector<1x1x16x128xf32>,
      %c0_84 = arith.constant 0 : index
      %c1_85 = arith.constant 1 : index
      %c0_86 = arith.constant 0 : index
      %c0_87 = arith.constant 0 : index
      %329 = vector.load %arg6[%c0_84, %c1_85, %c0_86, %c0_87] : memref<4x3x16x128xf32, #tpu.memory_space<vmem>>, vector<1x1x16x128xf32>
      %330 = vector.shape_cast %329 : vector<1x1x16x128xf32> to vector<16x128xf32>
      %331 = vector.shape_cast %65 : vector<16x128xf32> to vector<1x1x16x128xf32>
      tpu.vector_store %arg6[%c0_84, %c1_85, %c0_86, %c0_87], %331 {strides = array<i32>} : memref<4x3x16x128xf32, #tpu.memory_space<vmem>>, vector<1x1x16x128xf32>,
      %c0_88 = arith.constant 0 : index
      %c2_89 = arith.constant 2 : index
      %c0_90 = arith.constant 0 : index
      %c0_91 = arith.constant 0 : index
      %332 = vector.load %arg6[%c0_88, %c2_89, %c0_90, %c0_91] : memref<4x3x16x128xf32, #tpu.memory_space<vmem>>, vector<1x1x16x128xf32>
      %333 = vector.shape_cast %332 : vector<1x1x16x128xf32> to vector<16x128xf32>
      %334 = vector.shape_cast %77 : vector<16x128xf32> to vector<1x1x16x128xf32>
      tpu.vector_store %arg6[%c0_88, %c2_89, %c0_90, %c0_91], %334 {strides = array<i32>} : memref<4x3x16x128xf32, #tpu.memory_space<vmem>>, vector<1x1x16x128xf32>,
    } else {
    }
    %c1_i32 = arith.constant 1 : i32
    %83 = arith.addi %1, %c1_i32 : i32
    %84 = arith.index_cast %83 : i32 to index
    %85 = memref.load %arg1[%84] : memref<8xi32, #tpu.memory_space<smem>>
    %c0_i32_20 = arith.constant 0 : i32
    %86 = arith.cmpi ne, %85, %c0_i32_20 : i32
    %c1 = arith.constant 1 : index
    %c0_21 = arith.constant 0 : index
    %c0_22 = arith.constant 0 : index
    %c0_23 = arith.constant 0 : index
    %87 = vector.load %arg2[%c1, %c0_21, %c0_22, %c0_23] : memref<4x3x16x128xf32, #tpu.memory_space<vmem>>, vector<1x3x16x128xf32>
    %88 = vector.shape_cast %87 : vector<1x3x16x128xf32> to vector<3x16x128xf32>
    %cst_24 = arith.constant 0.000000e+00 : f32
    %89 = vector.broadcast %cst_24 : f32 to vector<3x16x128xf32>
    %90 = arith.cmpf oeq, %88, %89 : vector<3x16x128xf32>
    %cst_25 = arith.constant 0.000000e+00 : f32
    %cst_26 = arith.constant 1.000000e+00 : f32
    %91 = vector.broadcast %cst_25 : f32 to vector<3x16x128xf32>
    %92 = vector.broadcast %cst_26 : f32 to vector<3x16x128xf32>
    %93 = arith.select %90, %91, %92 : vector<3x16x128xi1>, vector<3x16x128xf32>
    %94 = arith.mulf %93, %88 : vector<3x16x128xf32>
    %95 = tpu.concatenate %94, %93 in 0 : vector<3x16x128xf32>, vector<3x16x128xf32> -> vector<6x16x128xf32>
    %cst_27 = arith.constant dense<0.000000e+00> : vector<6x128xf32>
    %96 = vector.multi_reduction <add>, %95, %cst_27 [1] : vector<6x16x128xf32> to vector<6x128xf32>
    %97 = vector.shape_cast %96 : vector<6x128xf32> to vector<6x1x128xf32>
    %cst_28 = arith.constant dense<0.000000e+00> : vector<6x1xf32>
    %98 = vector.multi_reduction <add>, %97, %cst_28 [2] : vector<6x1x128xf32> to vector<6x1xf32>
    %99 = vector.shape_cast %98 : vector<6x1xf32> to vector<6x1x1xf32>
    %100 = vector.extract_strided_slice %99 {offsets = [0, 0, 0], sizes = [3, 1, 1], strides = [1, 1, 1]} : vector<6x1x1xf32> to vector<3x1x1xf32>
    %101 = vector.extract_strided_slice %99 {offsets = [3, 0, 0], sizes = [3, 1, 1], strides = [1, 1, 1]} : vector<6x1x1xf32> to vector<3x1x1xf32>
    %cst_29 = arith.constant 9.99999974E-6 : f32
    %102 = vector.broadcast %cst_29 : f32 to vector<3x1x1xf32>
    %103 = arith.addf %101, %102 : vector<3x1x1xf32>
    %104 = arith.divf %100, %103 : vector<3x1x1xf32>
    %105 = vector.broadcast %104 : vector<3x1x1xf32> to vector<3x16x128xf32>
    %106 = arith.subf %88, %105 : vector<3x16x128xf32>
    %c1_30 = arith.constant 1 : index
    %c0_31 = arith.constant 0 : index
    %c0_32 = arith.constant 0 : index
    %107 = vector.load %arg4[%c1_30, %c0_31, %c0_32] : memref<4x3x3xf32, #tpu.memory_space<vmem>>, vector<1x3x3xf32>
    %108 = vector.shape_cast %107 : vector<1x3x3xf32> to vector<3x3xf32>
    %c1_33 = arith.constant 1 : index
    %c0_34 = arith.constant 0 : index
    %c0_35 = arith.constant 0 : index
    %c0_36 = arith.constant 0 : index
    %109 = vector.load %arg3[%c1_33, %c0_34, %c0_35, %c0_36] : memref<4x3x16x1xf32, #tpu.memory_space<vmem>>, vector<1x3x16x1xf32>
    %110 = vector.shape_cast %109 : vector<1x3x16x1xf32> to vector<3x16x1xf32>
    %111 = vector.extract_strided_slice %108 {offsets = [0, 0], sizes = [1, 1], strides = [1, 1]} : vector<3x3xf32> to vector<1x1xf32>
    %112 = vector.extract_strided_slice %106 {offsets = [0, 0, 0], sizes = [1, 16, 128], strides = [1, 1, 1]} : vector<3x16x128xf32> to vector<1x16x128xf32>
    %113 = vector.shape_cast %112 : vector<1x16x128xf32> to vector<16x128xf32>
    %114 = vector.broadcast %111 : vector<1x1xf32> to vector<16x128xf32>
    %115 = arith.mulf %114, %113 : vector<16x128xf32>
    %116 = vector.extract_strided_slice %108 {offsets = [0, 1], sizes = [1, 1], strides = [1, 1]} : vector<3x3xf32> to vector<1x1xf32>
    %117 = vector.extract_strided_slice %106 {offsets = [1, 0, 0], sizes = [1, 16, 128], strides = [1, 1, 1]} : vector<3x16x128xf32> to vector<1x16x128xf32>
    %118 = vector.shape_cast %117 : vector<1x16x128xf32> to vector<16x128xf32>
    %119 = vector.broadcast %116 : vector<1x1xf32> to vector<16x128xf32>
    %120 = arith.mulf %119, %118 : vector<16x128xf32>
    %121 = arith.addf %115, %120 : vector<16x128xf32>
    %122 = vector.extract_strided_slice %110 {offsets = [0, 0, 0], sizes = [1, 16, 1], strides = [1, 1, 1]} : vector<3x16x1xf32> to vector<1x16x1xf32>
    %123 = vector.shape_cast %122 : vector<1x16x1xf32> to vector<16x1xf32>
    %124 = vector.broadcast %123 : vector<16x1xf32> to vector<16x128xf32>
    %125 = arith.addf %121, %124 : vector<16x128xf32>
    %126 = vector.extract_strided_slice %93 {offsets = [0, 0, 0], sizes = [1, 16, 128], strides = [1, 1, 1]} : vector<3x16x128xf32> to vector<1x16x128xf32>
    %127 = vector.shape_cast %126 : vector<1x16x128xf32> to vector<16x128xf32>
    %128 = arith.mulf %125, %127 : vector<16x128xf32>
    %129 = vector.extract_strided_slice %108 {offsets = [1, 0], sizes = [1, 1], strides = [1, 1]} : vector<3x3xf32> to vector<1x1xf32>
    %130 = vector.extract_strided_slice %106 {offsets = [0, 0, 0], sizes = [1, 16, 128], strides = [1, 1, 1]} : vector<3x16x128xf32> to vector<1x16x128xf32>
    %131 = vector.shape_cast %130 : vector<1x16x128xf32> to vector<16x128xf32>
    %132 = vector.broadcast %129 : vector<1x1xf32> to vector<16x128xf32>
    %133 = arith.mulf %132, %131 : vector<16x128xf32>
    %134 = vector.extract_strided_slice %108 {offsets = [1, 1], sizes = [1, 1], strides = [1, 1]} : vector<3x3xf32> to vector<1x1xf32>
    %135 = vector.extract_strided_slice %106 {offsets = [1, 0, 0], sizes = [1, 16, 128], strides = [1, 1, 1]} : vector<3x16x128xf32> to vector<1x16x128xf32>
    %136 = vector.shape_cast %135 : vector<1x16x128xf32> to vector<16x128xf32>
    %137 = vector.broadcast %134 : vector<1x1xf32> to vector<16x128xf32>
    %138 = arith.mulf %137, %136 : vector<16x128xf32>
    %139 = arith.addf %133, %138 : vector<16x128xf32>
    %140 = vector.extract_strided_slice %110 {offsets = [1, 0, 0], sizes = [1, 16, 1], strides = [1, 1, 1]} : vector<3x16x1xf32> to vector<1x16x1xf32>
    %141 = vector.shape_cast %140 : vector<1x16x1xf32> to vector<16x1xf32>
    %142 = vector.broadcast %141 : vector<16x1xf32> to vector<16x128xf32>
    %143 = arith.addf %139, %142 : vector<16x128xf32>
    %144 = vector.extract_strided_slice %93 {offsets = [1, 0, 0], sizes = [1, 16, 128], strides = [1, 1, 1]} : vector<3x16x128xf32> to vector<1x16x128xf32>
    %145 = vector.shape_cast %144 : vector<1x16x128xf32> to vector<16x128xf32>
    %146 = arith.mulf %143, %145 : vector<16x128xf32>
    %147 = vector.extract_strided_slice %108 {offsets = [2, 2], sizes = [1, 1], strides = [1, 1]} : vector<3x3xf32> to vector<1x1xf32>
    %148 = vector.extract_strided_slice %106 {offsets = [2, 0, 0], sizes = [1, 16, 128], strides = [1, 1, 1]} : vector<3x16x128xf32> to vector<1x16x128xf32>
    %149 = vector.shape_cast %148 : vector<1x16x128xf32> to vector<16x128xf32>
    %150 = vector.broadcast %147 : vector<1x1xf32> to vector<16x128xf32>
    %151 = arith.mulf %150, %149 : vector<16x128xf32>
    %152 = vector.extract_strided_slice %110 {offsets = [2, 0, 0], sizes = [1, 16, 1], strides = [1, 1, 1]} : vector<3x16x1xf32> to vector<1x16x1xf32>
    %153 = vector.shape_cast %152 : vector<1x16x1xf32> to vector<16x1xf32>
    %154 = vector.broadcast %153 : vector<16x1xf32> to vector<16x128xf32>
    %155 = arith.addf %151, %154 : vector<16x128xf32>
    %156 = vector.extract_strided_slice %93 {offsets = [2, 0, 0], sizes = [1, 16, 128], strides = [1, 1, 1]} : vector<3x16x128xf32> to vector<1x16x128xf32>
    %157 = vector.shape_cast %156 : vector<1x16x128xf32> to vector<16x128xf32>
    %158 = arith.mulf %155, %157 : vector<16x128xf32>
    %159 = arith.extui %86 : i1 to i32
    %c0_i32_37 = arith.constant 0 : i32
    %160 = arith.cmpi ne, %159, %c0_i32_37 : i32
    scf.if %160 {
      %cst_80 = arith.constant dense<0.000000e+00> : vector<16x128xf32>
      %326 = tpu.matmul %0, %128, %cst_80 {dimension_numbers = #tpu.dot_dimension_numbers<[1], [0], [0], [1], [0, 0, 1, 1], [], []>} : vector<16x16xf32>, vector<16x128xf32>, vector<16x128xf32> -> vector<16x128xf32>
      %c1_81 = arith.constant 1 : index
      %c0_82 = arith.constant 0 : index
      %c0_83 = arith.constant 0 : index
      %c0_84 = arith.constant 0 : index
      %327 = vector.load %arg6[%c1_81, %c0_82, %c0_83, %c0_84] : memref<4x3x16x128xf32, #tpu.memory_space<vmem>>, vector<1x1x16x128xf32>
      %328 = vector.shape_cast %327 : vector<1x1x16x128xf32> to vector<16x128xf32>
      %329 = vector.shape_cast %326 : vector<16x128xf32> to vector<1x1x16x128xf32>
      tpu.vector_store %arg6[%c1_81, %c0_82, %c0_83, %c0_84], %329 {strides = array<i32>} : memref<4x3x16x128xf32, #tpu.memory_space<vmem>>, vector<1x1x16x128xf32>,
      %cst_85 = arith.constant dense<0.000000e+00> : vector<16x128xf32>
      %330 = tpu.matmul %0, %146, %cst_85 {dimension_numbers = #tpu.dot_dimension_numbers<[1], [0], [0], [1], [0, 0, 1, 1], [], []>} : vector<16x16xf32>, vector<16x128xf32>, vector<16x128xf32> -> vector<16x128xf32>
      %c1_86 = arith.constant 1 : index
      %c1_87 = arith.constant 1 : index
      %c0_88 = arith.constant 0 : index
      %c0_89 = arith.constant 0 : index
      %331 = vector.load %arg6[%c1_86, %c1_87, %c0_88, %c0_89] : memref<4x3x16x128xf32, #tpu.memory_space<vmem>>, vector<1x1x16x128xf32>
      %332 = vector.shape_cast %331 : vector<1x1x16x128xf32> to vector<16x128xf32>
      %333 = vector.shape_cast %330 : vector<16x128xf32> to vector<1x1x16x128xf32>
      tpu.vector_store %arg6[%c1_86, %c1_87, %c0_88, %c0_89], %333 {strides = array<i32>} : memref<4x3x16x128xf32, #tpu.memory_space<vmem>>, vector<1x1x16x128xf32>,
      %cst_90 = arith.constant dense<0.000000e+00> : vector<16x128xf32>
      %334 = tpu.matmul %0, %158, %cst_90 {dimension_numbers = #tpu.dot_dimension_numbers<[1], [0], [0], [1], [0, 0, 1, 1], [], []>} : vector<16x16xf32>, vector<16x128xf32>, vector<16x128xf32> -> vector<16x128xf32>
      %c1_91 = arith.constant 1 : index
      %c2_92 = arith.constant 2 : index
      %c0_93 = arith.constant 0 : index
      %c0_94 = arith.constant 0 : index
      %335 = vector.load %arg6[%c1_91, %c2_92, %c0_93, %c0_94] : memref<4x3x16x128xf32, #tpu.memory_space<vmem>>, vector<1x1x16x128xf32>
      %336 = vector.shape_cast %335 : vector<1x1x16x128xf32> to vector<16x128xf32>
      %337 = vector.shape_cast %334 : vector<16x128xf32> to vector<1x1x16x128xf32>
      tpu.vector_store %arg6[%c1_91, %c2_92, %c0_93, %c0_94], %337 {strides = array<i32>} : memref<4x3x16x128xf32, #tpu.memory_space<vmem>>, vector<1x1x16x128xf32>,
    } else {
    }
    %true_38 = arith.constant true
    %161 = arith.xori %86, %true_38 : i1
    %162 = arith.extui %161 : i1 to i32
    %c0_i32_39 = arith.constant 0 : i32
    %163 = arith.cmpi ne, %162, %c0_i32_39 : i32
    scf.if %163 {
      %c1_80 = arith.constant 1 : index
      %c0_81 = arith.constant 0 : index
      %c0_82 = arith.constant 0 : index
      %c0_83 = arith.constant 0 : index
      %326 = vector.load %arg6[%c1_80, %c0_81, %c0_82, %c0_83] : memref<4x3x16x128xf32, #tpu.memory_space<vmem>>, vector<1x1x16x128xf32>
      %327 = vector.shape_cast %326 : vector<1x1x16x128xf32> to vector<16x128xf32>
      %328 = vector.shape_cast %128 : vector<16x128xf32> to vector<1x1x16x128xf32>
      tpu.vector_store %arg6[%c1_80, %c0_81, %c0_82, %c0_83], %328 {strides = array<i32>} : memref<4x3x16x128xf32, #tpu.memory_space<vmem>>, vector<1x1x16x128xf32>,
      %c1_84 = arith.constant 1 : index
      %c1_85 = arith.constant 1 : index
      %c0_86 = arith.constant 0 : index
      %c0_87 = arith.constant 0 : index
      %329 = vector.load %arg6[%c1_84, %c1_85, %c0_86, %c0_87] : memref<4x3x16x128xf32, #tpu.memory_space<vmem>>, vector<1x1x16x128xf32>
      %330 = vector.shape_cast %329 : vector<1x1x16x128xf32> to vector<16x128xf32>
      %331 = vector.shape_cast %146 : vector<16x128xf32> to vector<1x1x16x128xf32>
      tpu.vector_store %arg6[%c1_84, %c1_85, %c0_86, %c0_87], %331 {strides = array<i32>} : memref<4x3x16x128xf32, #tpu.memory_space<vmem>>, vector<1x1x16x128xf32>,
      %c1_88 = arith.constant 1 : index
      %c2_89 = arith.constant 2 : index
      %c0_90 = arith.constant 0 : index
      %c0_91 = arith.constant 0 : index
      %332 = vector.load %arg6[%c1_88, %c2_89, %c0_90, %c0_91] : memref<4x3x16x128xf32, #tpu.memory_space<vmem>>, vector<1x1x16x128xf32>
      %333 = vector.shape_cast %332 : vector<1x1x16x128xf32> to vector<16x128xf32>
      %334 = vector.shape_cast %158 : vector<16x128xf32> to vector<1x1x16x128xf32>
      tpu.vector_store %arg6[%c1_88, %c2_89, %c0_90, %c0_91], %334 {strides = array<i32>} : memref<4x3x16x128xf32, #tpu.memory_space<vmem>>, vector<1x1x16x128xf32>,
    } else {
    }
    %c2_i32 = arith.constant 2 : i32
    %164 = arith.addi %1, %c2_i32 : i32
    %165 = arith.index_cast %164 : i32 to index
    %166 = memref.load %arg1[%165] : memref<8xi32, #tpu.memory_space<smem>>
    %c0_i32_40 = arith.constant 0 : i32
    %167 = arith.cmpi ne, %166, %c0_i32_40 : i32
    %c2 = arith.constant 2 : index
    %c0_41 = arith.constant 0 : index
    %c0_42 = arith.constant 0 : index
    %c0_43 = arith.constant 0 : index
    %168 = vector.load %arg2[%c2, %c0_41, %c0_42, %c0_43] : memref<4x3x16x128xf32, #tpu.memory_space<vmem>>, vector<1x3x16x128xf32>
    %169 = vector.shape_cast %168 : vector<1x3x16x128xf32> to vector<3x16x128xf32>
    %cst_44 = arith.constant 0.000000e+00 : f32
    %170 = vector.broadcast %cst_44 : f32 to vector<3x16x128xf32>
    %171 = arith.cmpf oeq, %169, %170 : vector<3x16x128xf32>
    %cst_45 = arith.constant 0.000000e+00 : f32
    %cst_46 = arith.constant 1.000000e+00 : f32
    %172 = vector.broadcast %cst_45 : f32 to vector<3x16x128xf32>
    %173 = vector.broadcast %cst_46 : f32 to vector<3x16x128xf32>
    %174 = arith.select %171, %172, %173 : vector<3x16x128xi1>, vector<3x16x128xf32>
    %175 = arith.mulf %174, %169 : vector<3x16x128xf32>
    %176 = tpu.concatenate %175, %174 in 0 : vector<3x16x128xf32>, vector<3x16x128xf32> -> vector<6x16x128xf32>
    %cst_47 = arith.constant dense<0.000000e+00> : vector<6x128xf32>
    %177 = vector.multi_reduction <add>, %176, %cst_47 [1] : vector<6x16x128xf32> to vector<6x128xf32>
    %178 = vector.shape_cast %177 : vector<6x128xf32> to vector<6x1x128xf32>
    %cst_48 = arith.constant dense<0.000000e+00> : vector<6x1xf32>
    %179 = vector.multi_reduction <add>, %178, %cst_48 [2] : vector<6x1x128xf32> to vector<6x1xf32>
    %180 = vector.shape_cast %179 : vector<6x1xf32> to vector<6x1x1xf32>
    %181 = vector.extract_strided_slice %180 {offsets = [0, 0, 0], sizes = [3, 1, 1], strides = [1, 1, 1]} : vector<6x1x1xf32> to vector<3x1x1xf32>
    %182 = vector.extract_strided_slice %180 {offsets = [3, 0, 0], sizes = [3, 1, 1], strides = [1, 1, 1]} : vector<6x1x1xf32> to vector<3x1x1xf32>
    %cst_49 = arith.constant 9.99999974E-6 : f32
    %183 = vector.broadcast %cst_49 : f32 to vector<3x1x1xf32>
    %184 = arith.addf %182, %183 : vector<3x1x1xf32>
    %185 = arith.divf %181, %184 : vector<3x1x1xf32>
    %186 = vector.broadcast %185 : vector<3x1x1xf32> to vector<3x16x128xf32>
    %187 = arith.subf %169, %186 : vector<3x16x128xf32>
    %c2_50 = arith.constant 2 : index
    %c0_51 = arith.constant 0 : index
    %c0_52 = arith.constant 0 : index
    %188 = vector.load %arg4[%c2_50, %c0_51, %c0_52] : memref<4x3x3xf32, #tpu.memory_space<vmem>>, vector<1x3x3xf32>
    %189 = vector.shape_cast %188 : vector<1x3x3xf32> to vector<3x3xf32>
    %c2_53 = arith.constant 2 : index
    %c0_54 = arith.constant 0 : index
    %c0_55 = arith.constant 0 : index
    %c0_56 = arith.constant 0 : index
    %190 = vector.load %arg3[%c2_53, %c0_54, %c0_55, %c0_56] : memref<4x3x16x1xf32, #tpu.memory_space<vmem>>, vector<1x3x16x1xf32>
    %191 = vector.shape_cast %190 : vector<1x3x16x1xf32> to vector<3x16x1xf32>
    %192 = vector.extract_strided_slice %189 {offsets = [0, 0], sizes = [1, 1], strides = [1, 1]} : vector<3x3xf32> to vector<1x1xf32>
    %193 = vector.extract_strided_slice %187 {offsets = [0, 0, 0], sizes = [1, 16, 128], strides = [1, 1, 1]} : vector<3x16x128xf32> to vector<1x16x128xf32>
    %194 = vector.shape_cast %193 : vector<1x16x128xf32> to vector<16x128xf32>
    %195 = vector.broadcast %192 : vector<1x1xf32> to vector<16x128xf32>
    %196 = arith.mulf %195, %194 : vector<16x128xf32>
    %197 = vector.extract_strided_slice %189 {offsets = [0, 1], sizes = [1, 1], strides = [1, 1]} : vector<3x3xf32> to vector<1x1xf32>
    %198 = vector.extract_strided_slice %187 {offsets = [1, 0, 0], sizes = [1, 16, 128], strides = [1, 1, 1]} : vector<3x16x128xf32> to vector<1x16x128xf32>
    %199 = vector.shape_cast %198 : vector<1x16x128xf32> to vector<16x128xf32>
    %200 = vector.broadcast %197 : vector<1x1xf32> to vector<16x128xf32>
    %201 = arith.mulf %200, %199 : vector<16x128xf32>
    %202 = arith.addf %196, %201 : vector<16x128xf32>
    %203 = vector.extract_strided_slice %191 {offsets = [0, 0, 0], sizes = [1, 16, 1], strides = [1, 1, 1]} : vector<3x16x1xf32> to vector<1x16x1xf32>
    %204 = vector.shape_cast %203 : vector<1x16x1xf32> to vector<16x1xf32>
    %205 = vector.broadcast %204 : vector<16x1xf32> to vector<16x128xf32>
    %206 = arith.addf %202, %205 : vector<16x128xf32>
    %207 = vector.extract_strided_slice %174 {offsets = [0, 0, 0], sizes = [1, 16, 128], strides = [1, 1, 1]} : vector<3x16x128xf32> to vector<1x16x128xf32>
    %208 = vector.shape_cast %207 : vector<1x16x128xf32> to vector<16x128xf32>
    %209 = arith.mulf %206, %208 : vector<16x128xf32>
    %210 = vector.extract_strided_slice %189 {offsets = [1, 0], sizes = [1, 1], strides = [1, 1]} : vector<3x3xf32> to vector<1x1xf32>
    %211 = vector.extract_strided_slice %187 {offsets = [0, 0, 0], sizes = [1, 16, 128], strides = [1, 1, 1]} : vector<3x16x128xf32> to vector<1x16x128xf32>
    %212 = vector.shape_cast %211 : vector<1x16x128xf32> to vector<16x128xf32>
    %213 = vector.broadcast %210 : vector<1x1xf32> to vector<16x128xf32>
    %214 = arith.mulf %213, %212 : vector<16x128xf32>
    %215 = vector.extract_strided_slice %189 {offsets = [1, 1], sizes = [1, 1], strides = [1, 1]} : vector<3x3xf32> to vector<1x1xf32>
    %216 = vector.extract_strided_slice %187 {offsets = [1, 0, 0], sizes = [1, 16, 128], strides = [1, 1, 1]} : vector<3x16x128xf32> to vector<1x16x128xf32>
    %217 = vector.shape_cast %216 : vector<1x16x128xf32> to vector<16x128xf32>
    %218 = vector.broadcast %215 : vector<1x1xf32> to vector<16x128xf32>
    %219 = arith.mulf %218, %217 : vector<16x128xf32>
    %220 = arith.addf %214, %219 : vector<16x128xf32>
    %221 = vector.extract_strided_slice %191 {offsets = [1, 0, 0], sizes = [1, 16, 1], strides = [1, 1, 1]} : vector<3x16x1xf32> to vector<1x16x1xf32>
    %222 = vector.shape_cast %221 : vector<1x16x1xf32> to vector<16x1xf32>
    %223 = vector.broadcast %222 : vector<16x1xf32> to vector<16x128xf32>
    %224 = arith.addf %220, %223 : vector<16x128xf32>
    %225 = vector.extract_strided_slice %174 {offsets = [1, 0, 0], sizes = [1, 16, 128], strides = [1, 1, 1]} : vector<3x16x128xf32> to vector<1x16x128xf32>
    %226 = vector.shape_cast %225 : vector<1x16x128xf32> to vector<16x128xf32>
    %227 = arith.mulf %224, %226 : vector<16x128xf32>
    %228 = vector.extract_strided_slice %189 {offsets = [2, 2], sizes = [1, 1], strides = [1, 1]} : vector<3x3xf32> to vector<1x1xf32>
    %229 = vector.extract_strided_slice %187 {offsets = [2, 0, 0], sizes = [1, 16, 128], strides = [1, 1, 1]} : vector<3x16x128xf32> to vector<1x16x128xf32>
    %230 = vector.shape_cast %229 : vector<1x16x128xf32> to vector<16x128xf32>
    %231 = vector.broadcast %228 : vector<1x1xf32> to vector<16x128xf32>
    %232 = arith.mulf %231, %230 : vector<16x128xf32>
    %233 = vector.extract_strided_slice %191 {offsets = [2, 0, 0], sizes = [1, 16, 1], strides = [1, 1, 1]} : vector<3x16x1xf32> to vector<1x16x1xf32>
    %234 = vector.shape_cast %233 : vector<1x16x1xf32> to vector<16x1xf32>
    %235 = vector.broadcast %234 : vector<16x1xf32> to vector<16x128xf32>
    %236 = arith.addf %232, %235 : vector<16x128xf32>
    %237 = vector.extract_strided_slice %174 {offsets = [2, 0, 0], sizes = [1, 16, 128], strides = [1, 1, 1]} : vector<3x16x128xf32> to vector<1x16x128xf32>
    %238 = vector.shape_cast %237 : vector<1x16x128xf32> to vector<16x128xf32>
    %239 = arith.mulf %236, %238 : vector<16x128xf32>
    %240 = arith.extui %167 : i1 to i32
    %c0_i32_57 = arith.constant 0 : i32
    %241 = arith.cmpi ne, %240, %c0_i32_57 : i32
    scf.if %241 {
      %cst_80 = arith.constant dense<0.000000e+00> : vector<16x128xf32>
      %326 = tpu.matmul %0, %209, %cst_80 {dimension_numbers = #tpu.dot_dimension_numbers<[1], [0], [0], [1], [0, 0, 1, 1], [], []>} : vector<16x16xf32>, vector<16x128xf32>, vector<16x128xf32> -> vector<16x128xf32>
      %c2_81 = arith.constant 2 : index
      %c0_82 = arith.constant 0 : index
      %c0_83 = arith.constant 0 : index
      %c0_84 = arith.constant 0 : index
      %327 = vector.load %arg6[%c2_81, %c0_82, %c0_83, %c0_84] : memref<4x3x16x128xf32, #tpu.memory_space<vmem>>, vector<1x1x16x128xf32>
      %328 = vector.shape_cast %327 : vector<1x1x16x128xf32> to vector<16x128xf32>
      %329 = vector.shape_cast %326 : vector<16x128xf32> to vector<1x1x16x128xf32>
      tpu.vector_store %arg6[%c2_81, %c0_82, %c0_83, %c0_84], %329 {strides = array<i32>} : memref<4x3x16x128xf32, #tpu.memory_space<vmem>>, vector<1x1x16x128xf32>,
      %cst_85 = arith.constant dense<0.000000e+00> : vector<16x128xf32>
      %330 = tpu.matmul %0, %227, %cst_85 {dimension_numbers = #tpu.dot_dimension_numbers<[1], [0], [0], [1], [0, 0, 1, 1], [], []>} : vector<16x16xf32>, vector<16x128xf32>, vector<16x128xf32> -> vector<16x128xf32>
      %c2_86 = arith.constant 2 : index
      %c1_87 = arith.constant 1 : index
      %c0_88 = arith.constant 0 : index
      %c0_89 = arith.constant 0 : index
      %331 = vector.load %arg6[%c2_86, %c1_87, %c0_88, %c0_89] : memref<4x3x16x128xf32, #tpu.memory_space<vmem>>, vector<1x1x16x128xf32>
      %332 = vector.shape_cast %331 : vector<1x1x16x128xf32> to vector<16x128xf32>
      %333 = vector.shape_cast %330 : vector<16x128xf32> to vector<1x1x16x128xf32>
      tpu.vector_store %arg6[%c2_86, %c1_87, %c0_88, %c0_89], %333 {strides = array<i32>} : memref<4x3x16x128xf32, #tpu.memory_space<vmem>>, vector<1x1x16x128xf32>,
      %cst_90 = arith.constant dense<0.000000e+00> : vector<16x128xf32>
      %334 = tpu.matmul %0, %239, %cst_90 {dimension_numbers = #tpu.dot_dimension_numbers<[1], [0], [0], [1], [0, 0, 1, 1], [], []>} : vector<16x16xf32>, vector<16x128xf32>, vector<16x128xf32> -> vector<16x128xf32>
      %c2_91 = arith.constant 2 : index
      %c2_92 = arith.constant 2 : index
      %c0_93 = arith.constant 0 : index
      %c0_94 = arith.constant 0 : index
      %335 = vector.load %arg6[%c2_91, %c2_92, %c0_93, %c0_94] : memref<4x3x16x128xf32, #tpu.memory_space<vmem>>, vector<1x1x16x128xf32>
      %336 = vector.shape_cast %335 : vector<1x1x16x128xf32> to vector<16x128xf32>
      %337 = vector.shape_cast %334 : vector<16x128xf32> to vector<1x1x16x128xf32>
      tpu.vector_store %arg6[%c2_91, %c2_92, %c0_93, %c0_94], %337 {strides = array<i32>} : memref<4x3x16x128xf32, #tpu.memory_space<vmem>>, vector<1x1x16x128xf32>,
    } else {
    }
    %true_58 = arith.constant true
    %242 = arith.xori %167, %true_58 : i1
    %243 = arith.extui %242 : i1 to i32
    %c0_i32_59 = arith.constant 0 : i32
    %244 = arith.cmpi ne, %243, %c0_i32_59 : i32
    scf.if %244 {
      %c2_80 = arith.constant 2 : index
      %c0_81 = arith.constant 0 : index
      %c0_82 = arith.constant 0 : index
      %c0_83 = arith.constant 0 : index
      %326 = vector.load %arg6[%c2_80, %c0_81, %c0_82, %c0_83] : memref<4x3x16x128xf32, #tpu.memory_space<vmem>>, vector<1x1x16x128xf32>
      %327 = vector.shape_cast %326 : vector<1x1x16x128xf32> to vector<16x128xf32>
      %328 = vector.shape_cast %209 : vector<16x128xf32> to vector<1x1x16x128xf32>
      tpu.vector_store %arg6[%c2_80, %c0_81, %c0_82, %c0_83], %328 {strides = array<i32>} : memref<4x3x16x128xf32, #tpu.memory_space<vmem>>, vector<1x1x16x128xf32>,
      %c2_84 = arith.constant 2 : index
      %c1_85 = arith.constant 1 : index
      %c0_86 = arith.constant 0 : index
      %c0_87 = arith.constant 0 : index
      %329 = vector.load %arg6[%c2_84, %c1_85, %c0_86, %c0_87] : memref<4x3x16x128xf32, #tpu.memory_space<vmem>>, vector<1x1x16x128xf32>
      %330 = vector.shape_cast %329 : vector<1x1x16x128xf32> to vector<16x128xf32>
      %331 = vector.shape_cast %227 : vector<16x128xf32> to vector<1x1x16x128xf32>
      tpu.vector_store %arg6[%c2_84, %c1_85, %c0_86, %c0_87], %331 {strides = array<i32>} : memref<4x3x16x128xf32, #tpu.memory_space<vmem>>, vector<1x1x16x128xf32>,
      %c2_88 = arith.constant 2 : index
      %c2_89 = arith.constant 2 : index
      %c0_90 = arith.constant 0 : index
      %c0_91 = arith.constant 0 : index
      %332 = vector.load %arg6[%c2_88, %c2_89, %c0_90, %c0_91] : memref<4x3x16x128xf32, #tpu.memory_space<vmem>>, vector<1x1x16x128xf32>
      %333 = vector.shape_cast %332 : vector<1x1x16x128xf32> to vector<16x128xf32>
      %334 = vector.shape_cast %239 : vector<16x128xf32> to vector<1x1x16x128xf32>
      tpu.vector_store %arg6[%c2_88, %c2_89, %c0_90, %c0_91], %334 {strides = array<i32>} : memref<4x3x16x128xf32, #tpu.memory_space<vmem>>, vector<1x1x16x128xf32>,
    } else {
    }
    %c3_i32 = arith.constant 3 : i32
    %245 = arith.addi %1, %c3_i32 : i32
    %246 = arith.index_cast %245 : i32 to index
    %247 = memref.load %arg1[%246] : memref<8xi32, #tpu.memory_space<smem>>
    %c0_i32_60 = arith.constant 0 : i32
    %248 = arith.cmpi ne, %247, %c0_i32_60 : i32
    %c3 = arith.constant 3 : index
    %c0_61 = arith.constant 0 : index
    %c0_62 = arith.constant 0 : index
    %c0_63 = arith.constant 0 : index
    %249 = vector.load %arg2[%c3, %c0_61, %c0_62, %c0_63] : memref<4x3x16x128xf32, #tpu.memory_space<vmem>>, vector<1x3x16x128xf32>
    %250 = vector.shape_cast %249 : vector<1x3x16x128xf32> to vector<3x16x128xf32>
    %cst_64 = arith.constant 0.000000e+00 : f32
    %251 = vector.broadcast %cst_64 : f32 to vector<3x16x128xf32>
    %252 = arith.cmpf oeq, %250, %251 : vector<3x16x128xf32>
    %cst_65 = arith.constant 0.000000e+00 : f32
    %cst_66 = arith.constant 1.000000e+00 : f32
    %253 = vector.broadcast %cst_65 : f32 to vector<3x16x128xf32>
    %254 = vector.broadcast %cst_66 : f32 to vector<3x16x128xf32>
    %255 = arith.select %252, %253, %254 : vector<3x16x128xi1>, vector<3x16x128xf32>
    %256 = arith.mulf %255, %250 : vector<3x16x128xf32>
    %257 = tpu.concatenate %256, %255 in 0 : vector<3x16x128xf32>, vector<3x16x128xf32> -> vector<6x16x128xf32>
    %cst_67 = arith.constant dense<0.000000e+00> : vector<6x128xf32>
    %258 = vector.multi_reduction <add>, %257, %cst_67 [1] : vector<6x16x128xf32> to vector<6x128xf32>
    %259 = vector.shape_cast %258 : vector<6x128xf32> to vector<6x1x128xf32>
    %cst_68 = arith.constant dense<0.000000e+00> : vector<6x1xf32>
    %260 = vector.multi_reduction <add>, %259, %cst_68 [2] : vector<6x1x128xf32> to vector<6x1xf32>
    %261 = vector.shape_cast %260 : vector<6x1xf32> to vector<6x1x1xf32>
    %262 = vector.extract_strided_slice %261 {offsets = [0, 0, 0], sizes = [3, 1, 1], strides = [1, 1, 1]} : vector<6x1x1xf32> to vector<3x1x1xf32>
    %263 = vector.extract_strided_slice %261 {offsets = [3, 0, 0], sizes = [3, 1, 1], strides = [1, 1, 1]} : vector<6x1x1xf32> to vector<3x1x1xf32>
    %cst_69 = arith.constant 9.99999974E-6 : f32
    %264 = vector.broadcast %cst_69 : f32 to vector<3x1x1xf32>
    %265 = arith.addf %263, %264 : vector<3x1x1xf32>
    %266 = arith.divf %262, %265 : vector<3x1x1xf32>
    %267 = vector.broadcast %266 : vector<3x1x1xf32> to vector<3x16x128xf32>
    %268 = arith.subf %250, %267 : vector<3x16x128xf32>
    %c3_70 = arith.constant 3 : index
    %c0_71 = arith.constant 0 : index
    %c0_72 = arith.constant 0 : index
    %269 = vector.load %arg4[%c3_70, %c0_71, %c0_72] : memref<4x3x3xf32, #tpu.memory_space<vmem>>, vector<1x3x3xf32>
    %270 = vector.shape_cast %269 : vector<1x3x3xf32> to vector<3x3xf32>
    %c3_73 = arith.constant 3 : index
    %c0_74 = arith.constant 0 : index
    %c0_75 = arith.constant 0 : index
    %c0_76 = arith.constant 0 : index
    %271 = vector.load %arg3[%c3_73, %c0_74, %c0_75, %c0_76] : memref<4x3x16x1xf32, #tpu.memory_space<vmem>>, vector<1x3x16x1xf32>
    %272 = vector.shape_cast %271 : vector<1x3x16x1xf32> to vector<3x16x1xf32>
    %273 = vector.extract_strided_slice %270 {offsets = [0, 0], sizes = [1, 1], strides = [1, 1]} : vector<3x3xf32> to vector<1x1xf32>
    %274 = vector.extract_strided_slice %268 {offsets = [0, 0, 0], sizes = [1, 16, 128], strides = [1, 1, 1]} : vector<3x16x128xf32> to vector<1x16x128xf32>
    %275 = vector.shape_cast %274 : vector<1x16x128xf32> to vector<16x128xf32>
    %276 = vector.broadcast %273 : vector<1x1xf32> to vector<16x128xf32>
    %277 = arith.mulf %276, %275 : vector<16x128xf32>
    %278 = vector.extract_strided_slice %270 {offsets = [0, 1], sizes = [1, 1], strides = [1, 1]} : vector<3x3xf32> to vector<1x1xf32>
    %279 = vector.extract_strided_slice %268 {offsets = [1, 0, 0], sizes = [1, 16, 128], strides = [1, 1, 1]} : vector<3x16x128xf32> to vector<1x16x128xf32>
    %280 = vector.shape_cast %279 : vector<1x16x128xf32> to vector<16x128xf32>
    %281 = vector.broadcast %278 : vector<1x1xf32> to vector<16x128xf32>
    %282 = arith.mulf %281, %280 : vector<16x128xf32>
    %283 = arith.addf %277, %282 : vector<16x128xf32>
    %284 = vector.extract_strided_slice %272 {offsets = [0, 0, 0], sizes = [1, 16, 1], strides = [1, 1, 1]} : vector<3x16x1xf32> to vector<1x16x1xf32>
    %285 = vector.shape_cast %284 : vector<1x16x1xf32> to vector<16x1xf32>
    %286 = vector.broadcast %285 : vector<16x1xf32> to vector<16x128xf32>
    %287 = arith.addf %283, %286 : vector<16x128xf32>
    %288 = vector.extract_strided_slice %255 {offsets = [0, 0, 0], sizes = [1, 16, 128], strides = [1, 1, 1]} : vector<3x16x128xf32> to vector<1x16x128xf32>
    %289 = vector.shape_cast %288 : vector<1x16x128xf32> to vector<16x128xf32>
    %290 = arith.mulf %287, %289 : vector<16x128xf32>
    %291 = vector.extract_strided_slice %270 {offsets = [1, 0], sizes = [1, 1], strides = [1, 1]} : vector<3x3xf32> to vector<1x1xf32>
    %292 = vector.extract_strided_slice %268 {offsets = [0, 0, 0], sizes = [1, 16, 128], strides = [1, 1, 1]} : vector<3x16x128xf32> to vector<1x16x128xf32>
    %293 = vector.shape_cast %292 : vector<1x16x128xf32> to vector<16x128xf32>
    %294 = vector.broadcast %291 : vector<1x1xf32> to vector<16x128xf32>
    %295 = arith.mulf %294, %293 : vector<16x128xf32>
    %296 = vector.extract_strided_slice %270 {offsets = [1, 1], sizes = [1, 1], strides = [1, 1]} : vector<3x3xf32> to vector<1x1xf32>
    %297 = vector.extract_strided_slice %268 {offsets = [1, 0, 0], sizes = [1, 16, 128], strides = [1, 1, 1]} : vector<3x16x128xf32> to vector<1x16x128xf32>
    %298 = vector.shape_cast %297 : vector<1x16x128xf32> to vector<16x128xf32>
    %299 = vector.broadcast %296 : vector<1x1xf32> to vector<16x128xf32>
    %300 = arith.mulf %299, %298 : vector<16x128xf32>
    %301 = arith.addf %295, %300 : vector<16x128xf32>
    %302 = vector.extract_strided_slice %272 {offsets = [1, 0, 0], sizes = [1, 16, 1], strides = [1, 1, 1]} : vector<3x16x1xf32> to vector<1x16x1xf32>
    %303 = vector.shape_cast %302 : vector<1x16x1xf32> to vector<16x1xf32>
    %304 = vector.broadcast %303 : vector<16x1xf32> to vector<16x128xf32>
    %305 = arith.addf %301, %304 : vector<16x128xf32>
    %306 = vector.extract_strided_slice %255 {offsets = [1, 0, 0], sizes = [1, 16, 128], strides = [1, 1, 1]} : vector<3x16x128xf32> to vector<1x16x128xf32>
    %307 = vector.shape_cast %306 : vector<1x16x128xf32> to vector<16x128xf32>
    %308 = arith.mulf %305, %307 : vector<16x128xf32>
    %309 = vector.extract_strided_slice %270 {offsets = [2, 2], sizes = [1, 1], strides = [1, 1]} : vector<3x3xf32> to vector<1x1xf32>
    %310 = vector.extract_strided_slice %268 {offsets = [2, 0, 0], sizes = [1, 16, 128], strides = [1, 1, 1]} : vector<3x16x128xf32> to vector<1x16x128xf32>
    %311 = vector.shape_cast %310 : vector<1x16x128xf32> to vector<16x128xf32>
    %312 = vector.broadcast %309 : vector<1x1xf32> to vector<16x128xf32>
    %313 = arith.mulf %312, %311 : vector<16x128xf32>
    %314 = vector.extract_strided_slice %272 {offsets = [2, 0, 0], sizes = [1, 16, 1], strides = [1, 1, 1]} : vector<3x16x1xf32> to vector<1x16x1xf32>
    %315 = vector.shape_cast %314 : vector<1x16x1xf32> to vector<16x1xf32>
    %316 = vector.broadcast %315 : vector<16x1xf32> to vector<16x128xf32>
    %317 = arith.addf %313, %316 : vector<16x128xf32>
    %318 = vector.extract_strided_slice %255 {offsets = [2, 0, 0], sizes = [1, 16, 128], strides = [1, 1, 1]} : vector<3x16x128xf32> to vector<1x16x128xf32>
    %319 = vector.shape_cast %318 : vector<1x16x128xf32> to vector<16x128xf32>
    %320 = arith.mulf %317, %319 : vector<16x128xf32>
    %321 = arith.extui %248 : i1 to i32
    %c0_i32_77 = arith.constant 0 : i32
    %322 = arith.cmpi ne, %321, %c0_i32_77 : i32
    scf.if %322 {
      %cst_80 = arith.constant dense<0.000000e+00> : vector<16x128xf32>
      %326 = tpu.matmul %0, %290, %cst_80 {dimension_numbers = #tpu.dot_dimension_numbers<[1], [0], [0], [1], [0, 0, 1, 1], [], []>} : vector<16x16xf32>, vector<16x128xf32>, vector<16x128xf32> -> vector<16x128xf32>
      %c3_81 = arith.constant 3 : index
      %c0_82 = arith.constant 0 : index
      %c0_83 = arith.constant 0 : index
      %c0_84 = arith.constant 0 : index
      %327 = vector.load %arg6[%c3_81, %c0_82, %c0_83, %c0_84] : memref<4x3x16x128xf32, #tpu.memory_space<vmem>>, vector<1x1x16x128xf32>
      %328 = vector.shape_cast %327 : vector<1x1x16x128xf32> to vector<16x128xf32>
      %329 = vector.shape_cast %326 : vector<16x128xf32> to vector<1x1x16x128xf32>
      tpu.vector_store %arg6[%c3_81, %c0_82, %c0_83, %c0_84], %329 {strides = array<i32>} : memref<4x3x16x128xf32, #tpu.memory_space<vmem>>, vector<1x1x16x128xf32>,
      %cst_85 = arith.constant dense<0.000000e+00> : vector<16x128xf32>
      %330 = tpu.matmul %0, %308, %cst_85 {dimension_numbers = #tpu.dot_dimension_numbers<[1], [0], [0], [1], [0, 0, 1, 1], [], []>} : vector<16x16xf32>, vector<16x128xf32>, vector<16x128xf32> -> vector<16x128xf32>
      %c3_86 = arith.constant 3 : index
      %c1_87 = arith.constant 1 : index
      %c0_88 = arith.constant 0 : index
      %c0_89 = arith.constant 0 : index
      %331 = vector.load %arg6[%c3_86, %c1_87, %c0_88, %c0_89] : memref<4x3x16x128xf32, #tpu.memory_space<vmem>>, vector<1x1x16x128xf32>
      %332 = vector.shape_cast %331 : vector<1x1x16x128xf32> to vector<16x128xf32>
      %333 = vector.shape_cast %330 : vector<16x128xf32> to vector<1x1x16x128xf32>
      tpu.vector_store %arg6[%c3_86, %c1_87, %c0_88, %c0_89], %333 {strides = array<i32>} : memref<4x3x16x128xf32, #tpu.memory_space<vmem>>, vector<1x1x16x128xf32>,
      %cst_90 = arith.constant dense<0.000000e+00> : vector<16x128xf32>
      %334 = tpu.matmul %0, %320, %cst_90 {dimension_numbers = #tpu.dot_dimension_numbers<[1], [0], [0], [1], [0, 0, 1, 1], [], []>} : vector<16x16xf32>, vector<16x128xf32>, vector<16x128xf32> -> vector<16x128xf32>
      %c3_91 = arith.constant 3 : index
      %c2_92 = arith.constant 2 : index
      %c0_93 = arith.constant 0 : index
      %c0_94 = arith.constant 0 : index
      %335 = vector.load %arg6[%c3_91, %c2_92, %c0_93, %c0_94] : memref<4x3x16x128xf32, #tpu.memory_space<vmem>>, vector<1x1x16x128xf32>
      %336 = vector.shape_cast %335 : vector<1x1x16x128xf32> to vector<16x128xf32>
      %337 = vector.shape_cast %334 : vector<16x128xf32> to vector<1x1x16x128xf32>
      tpu.vector_store %arg6[%c3_91, %c2_92, %c0_93, %c0_94], %337 {strides = array<i32>} : memref<4x3x16x128xf32, #tpu.memory_space<vmem>>, vector<1x1x16x128xf32>,
    } else {
    }
    %true_78 = arith.constant true
    %323 = arith.xori %248, %true_78 : i1
    %324 = arith.extui %323 : i1 to i32
    %c0_i32_79 = arith.constant 0 : i32
    %325 = arith.cmpi ne, %324, %c0_i32_79 : i32
    scf.if %325 {
      %c3_80 = arith.constant 3 : index
      %c0_81 = arith.constant 0 : index
      %c0_82 = arith.constant 0 : index
      %c0_83 = arith.constant 0 : index
      %326 = vector.load %arg6[%c3_80, %c0_81, %c0_82, %c0_83] : memref<4x3x16x128xf32, #tpu.memory_space<vmem>>, vector<1x1x16x128xf32>
      %327 = vector.shape_cast %326 : vector<1x1x16x128xf32> to vector<16x128xf32>
      %328 = vector.shape_cast %290 : vector<16x128xf32> to vector<1x1x16x128xf32>
      tpu.vector_store %arg6[%c3_80, %c0_81, %c0_82, %c0_83], %328 {strides = array<i32>} : memref<4x3x16x128xf32, #tpu.memory_space<vmem>>, vector<1x1x16x128xf32>,
      %c3_84 = arith.constant 3 : index
      %c1_85 = arith.constant 1 : index
      %c0_86 = arith.constant 0 : index
      %c0_87 = arith.constant 0 : index
      %329 = vector.load %arg6[%c3_84, %c1_85, %c0_86, %c0_87] : memref<4x3x16x128xf32, #tpu.memory_space<vmem>>, vector<1x1x16x128xf32>
      %330 = vector.shape_cast %329 : vector<1x1x16x128xf32> to vector<16x128xf32>
      %331 = vector.shape_cast %308 : vector<16x128xf32> to vector<1x1x16x128xf32>
      tpu.vector_store %arg6[%c3_84, %c1_85, %c0_86, %c0_87], %331 {strides = array<i32>} : memref<4x3x16x128xf32, #tpu.memory_space<vmem>>, vector<1x1x16x128xf32>,
      %c3_88 = arith.constant 3 : index
      %c2_89 = arith.constant 2 : index
      %c0_90 = arith.constant 0 : index
      %c0_91 = arith.constant 0 : index
      %332 = vector.load %arg6[%c3_88, %c2_89, %c0_90, %c0_91] : memref<4x3x16x128xf32, #tpu.memory_space<vmem>>, vector<1x1x16x128xf32>
      %333 = vector.shape_cast %332 : vector<1x1x16x128xf32> to vector<16x128xf32>
      %334 = vector.shape_cast %320 : vector<16x128xf32> to vector<1x1x16x128xf32>
      tpu.vector_store %arg6[%c3_88, %c2_89, %c0_90, %c0_91], %334 {strides = array<i32>} : memref<4x3x16x128xf32, #tpu.memory_space<vmem>>, vector<1x1x16x128xf32>,
    } else {
    }
    return
  }
  func.func @transform_0(%arg0: i32, %arg1: memref<8xi32, #tpu.memory_space<smem>>) -> (i32, i32, i32, i32) {
    %c0_i32 = arith.constant 0 : i32
    %c0_i32_0 = arith.constant 0 : i32
    %c0_i32_1 = arith.constant 0 : i32
    %c0_i32_2 = arith.constant 0 : i32
    return %arg0, %c0_i32, %c0_i32_0, %c0_i32_1 : i32, i32, i32, i32
  }
  func.func @transform_1(%arg0: i32, %arg1: memref<8xi32, #tpu.memory_space<smem>>) -> (i32, i32, i32, i32) {
    %c0_i32 = arith.constant 0 : i32
    %c0_i32_0 = arith.constant 0 : i32
    %c0_i32_1 = arith.constant 0 : i32
    %c0_i32_2 = arith.constant 0 : i32
    return %arg0, %c0_i32, %c0_i32_0, %c0_i32_1 : i32, i32, i32, i32
  }
  func.func @transform_2(%arg0: i32, %arg1: memref<8xi32, #tpu.memory_space<smem>>) -> (i32, i32, i32) {
    %c0_i32 = arith.constant 0 : i32
    %c0_i32_0 = arith.constant 0 : i32
    %c0_i32_1 = arith.constant 0 : i32
    return %arg0, %c0_i32, %c0_i32_0 : i32, i32, i32
  }
  func.func @transform_3(%arg0: i32, %arg1: memref<8xi32, #tpu.memory_space<smem>>) -> (i32, i32) {
    %c0_i32 = arith.constant 0 : i32
    %c0_i32_0 = arith.constant 0 : i32
    %c0_i32_1 = arith.constant 0 : i32
    return %c0_i32, %c0_i32_0 : i32, i32
  }
  func.func @transform_4(%arg0: i32, %arg1: memref<8xi32, #tpu.memory_space<smem>>) -> (i32, i32, i32, i32) {
    %c0_i32 = arith.constant 0 : i32
    %c0_i32_0 = arith.constant 0 : i32
    %c0_i32_1 = arith.constant 0 : i32
    %c0_i32_2 = arith.constant 0 : i32
    return %arg0, %c0_i32, %c0_i32_0, %c0_i32_1 : i32, i32, i32, i32
  }
}

</mosaic_0001>

<bundles_post_ra>
// kernel: tpu_custom_call.1
= control target key start
LH: loop header
LB: loop body
LE: loop exit
PB: predicated region body
PF: predicated region fallthrough
CT: control target
= control target key end

     0   :  { %s2004_s21 = smov [#allocation3]   ;;  %s2716_s0 = inlined_call_operand.vmem [shape: s32[8], index: 0, kind: input, shape index: {}]   ;;  %s2717_s1 = inlined_call_operand.vmem [shape: f32[8,3,16,128], index: 1, kind: input, shape index: {}]   ;;  %s2718_s2 = inlined_call_operand.vmem [shape: f32[8,3,16,1], index: 2, kind: input, shape index: {}]   ;;  %s2719_s3 = inlined_call_operand.vmem [shape: f32[8,3,3], index: 3, kind: input, shape index: {}]   ;;  %s2720_s4 = inlined_call_operand.vmem [shape: f32[16,16], index: 4, kind: input, shape index: {}]   ;;  %s2721_s5 = inlined_call_operand.hbm [shape: f32[8,3,16,128], index: 5, kind: output, shape index: {}]  }
   0x1   :  { %s11_s20 = sshll.u32 %s2716_s0, 4  ;;  %s12_s20 = int_to_ptr.vmem [resolvable:$true] %s11_s20 }
   0x2   :  { %14 = dma.vmem_to_smem %s12_s20, 16, %s2004_s21, [#allocation2] }
   0x3   :  { %1982 = dma.done.wait [#allocation2], 16 }
   0x4   :  { %1983 = vsyncadd [#allocation2], 4294967280 }
   0x5   :  { %17 = sfence }
   0x6   :  { %18 = vsyncpa [#allocation5], 0 }
   0x7   :  { %20 = vsyncpa [#allocation5 + $0x1], 0  ;;  %s2044_s22 = smov 0   ;;  %s2046_s23 = smov 0  }
   0x8   :  { %s2048_s24 = smov 0   ;;  %s2050_s25 = smov 0  }
   0x9 LB: > { %s2065_s0 = sadd.s32 4294967295, %s2002_s25   ;;  %s1662_s26 = sadd.s32 4294967294, %s2002_s25   ;;  %s2002_s25 = sphi %s2050_s25, %s2727_s25   ;;  %s1998_s24 = sphi %s2048_s24, %s2726_s24   ;;  %s1994_s23 = sphi %s2046_s23, %s2725_s23   ;;  %s1990_s22 = sphi %s2044_s22, %s2724_s22  }
   0xa   : > { %s2069_s27 = sadd.s32 1, %s2002_s25   ;;  %s132_s28 = sadd.s32 1, %s1998_s24 }
   0xb   : > { %s129_s29 = ssub.s32 %s2002_s25, %s2069_s27  ;;  %p142_p0 = scmp.ne.s32.totalorder %s1998_s24, %s1994_s23 }
   0xc   : > { %p130_p1 = scmp.eq.s32.totalorder %s129_s29, 0  ;;  %p143_p2 = scmp.eq.s32.totalorder %s2065_s0, 1 }
   0xd   : > { %p148_p3 = scmp.ne.s32.totalorder %s1994_s23, %s1990_s22  ;;  %p149_p4 = scmp.eq.s32.totalorder %s1662_s26, 1 }
   0xe   : > { %s2080_s30 = scalar_select %p130_p1, %s1998_s24, %s132_s28  }
   0xf   : > { %p2082_p5 = por %p143_p2, %p142_p0  ;;  %p2086_p6 = por %p149_p4, %p148_p3 }
  0x10   : > { %p1665_p7 = scmp.ge.s32.totalorder %s2002_s25, 1  ;;  %p199_p8 = scmp.lt.s32.totalorder %s2002_s25, 3 }
  0x12   : > { %p200_p9 = pnand %p1665_p7, %p199_p8 }
  0x13   : > { %s2093_s8 = sshll.u32 (!%p200_p9), %s2065_s0, 2  ;;  %s234_s10 = sand.u32 (!%p200_p9), 1, %s1994_s23  }
  0x14   : > { %203 = sbr.rel (%p200_p9) target bundleno = 1449 (0x5a9), region = 36  ;;  %p238_p10 = scmp.lt.s32.totalorder (!%p200_p9), %s2093_s8, 7 }
  0x15   : > { %s2097_s9 = sld [smem:[#allocation3 + %s2093_s8]] (!%p200_p9)  ;;  %s2105_s12 = smul.u32 (!%p200_p9), 192, %s234_s10 }
  0x16   : > { %s2005_s21 = smov (!%p200_p9), 127   ;;  %s2006_s26 = smov (!%p200_p9), 126  }
  0x17   : > { %s2252_s15 = scalar_lea.vmem (!%p200_p9), [#allocation4], %s2105_s12 }
  0x19   : > { %s2101_s11 = scalar_select %p238_p10, %s2093_s8, 7  ;;  %v2007_v6 = vmov 1.0   ;;  %v2008_v42 = vmov 0  }
  0x1a   : > { %1890 = vset.pattern.permute.xlu2 %v2008_v42  ;;  %1892 = vset.pattern.permute.xlu0 %v2008_v42 }
  0x1b   : > { %s1671_s13 = sshll.u32 %s2101_s11, 2  ;;  %s1802_s14 = smul.u32 48, %s2101_s11  ;;  %1891 = vset.pattern.permute.xlu1 %v2008_v42 }
  0x1c   : > { %s2112_s17 = scalar_lea.vmem %s2719_s3, %s1671_s13  ;;  %p1673_p11 = scmp.eq.s32.totalorder %s2097_s9, 0 }
  0x1d   : > { %v2115_v0 = vld [vmem:[%s2112_s17] sm:$0x7]  ;;  %s2122_s20 = scalar_lea.vmem %s2717_s1, %s1802_s14  ;;  %s2201_s13 = scalar_lea.vmem %s2718_s2, %s1802_s14 }
  0x1e   : > { %408 = vrot.lane.b32.xlu0 %v2115_v0, %s2005_s21  ;;  %v460_v1 = vrot.slane %v2115_v0, 2  ;;  %v2128_v2 = vld [vmem:[%s2122_s20 + $0x10] sm:$0xff]  ;;  %v2131_v3 = vld [vmem:[%s2122_s20 + $0x18] sm:$0xff]  ;;  %v2134_v4 = vld [vmem:[%s2122_s20 + $0x20] sm:$0xff]  ;;  %1803 = vpush %v2115_v0  ;;  %v431_v14 = vrot.slane %v2115_v0, 1 }
  0x1f   : > { %vm271_vm0 = vcmp.eq.f32.partialorder %v2128_v2, 0.0  ;;  %vm272_vm1 = vcmp.eq.f32.partialorder %v2131_v3, 0.0  ;;  %v2140_v5 = vld [vmem:[%s2122_s20 + $0x28] sm:$0xff]  ;;  %vm273_vm2 = vcmp.eq.f32.partialorder %v2134_v4, 0.0  ;;  %v2167_v19 = vld [vmem:[%s2122_s20] sm:$0xff] }
  0x20   : > { %461 = vrot.lane.b32.xlu1 %v460_v1, %s2006_s26  ;;  %v2145_v7 = vsel %vm271_vm0, 0.0, %v2007_v6  ;;  %v2148_v8 = vsel %vm272_vm1, 0.0, %v2007_v6  ;;  %vm274_vm3 = vcmp.eq.f32.partialorder %v2140_v5, 0.0  ;;  %v2152_v9 = vsel %vm273_vm2, 0.0, %v2007_v6  ;;  %v2170_v21 = vld [vmem:[%s2122_s20 + $0x8] sm:$0xff] }
  0x21   : > { %v315_v10 = vadd.f32 %v2148_v8, %v2145_v7  ;;  %v2157_v11 = vsel %vm274_vm3, 0.0, %v2007_v6  ;;  %v283_v12 = vmul.f32 %v2145_v7, %v2128_v2  ;;  %v284_v13 = vmul.f32 %v2148_v8, %v2131_v3 }
  0x22   : > { %v322_v15 = vadd.f32 %v2157_v11, %v2152_v9  ;;  %v285_v23 = vmul.f32 %v2152_v9, %v2134_v4  ;;  %v286_v24 = vmul.f32 %v2157_v11, %v2140_v5  ;;  %vm269_vm4 = vcmp.eq.f32.partialorder %v2167_v19, 0.0 }
  0x23   : > { %v316_v16 = vrot.slane %v315_v10, 4  ;;  %v294_v17 = vadd.f32 %v284_v13, %v283_v12  ;;  %vm270_vm5 = vcmp.eq.f32.partialorder %v2170_v21, 0.0  ;;  %v2182_v30 = vsel %vm269_vm4, 0.0, %v2007_v6  ;;  %v397_v12 = vld [vmem:[%s2201_s13 + $0x8] sm:$0xff]  ;;  %v399_v13 = vld [vmem:[%s2201_s13 + $0x18] sm:$0xff] }
  0x24   : > { %v323_v18 = vrot.slane %v322_v15, 4  ;;  %v301_v29 = vadd.f32 %v286_v24, %v285_v23  ;;  %v2185_v34 = vsel %vm270_vm5, 0.0, %v2007_v6  ;;  %v281_v40 = vmul.f32 %v2182_v30, %v2167_v19 }
  0x25   : > { %v317_v20 = vadd.f32 %v316_v16, %v315_v10  ;;  %v295_v26 = vrot.slane %v294_v17, 4  ;;  %v308_v36 = vadd.f32 %v2185_v34, %v2182_v30  ;;  %v282_v41 = vmul.f32 %v2185_v34, %v2170_v21  ;;  %v396_v10 = vld [vmem:[%s2201_s13] sm:$0xff] }
  0x26   : > { %437 = vrot.lane.b32.xlu0 %v431_v14, %s2005_s21  ;;  %v324_v22 = vadd.f32 %v323_v18, %v322_v15  ;;  %v302_v39 = vrot.slane %v301_v29, 4  ;;  %v398_v15 = vld [vmem:[%s2201_s13 + $0x10] sm:$0xff]  ;;  %v400_v16 = vld [vmem:[%s2201_s13 + $0x20] sm:$0xff]  ;;  %v2216_v18 = vld [vmem:[%s2720_s4 + $0x8] sm:$0xff] }
  0x27   : > { %v318_v25 = vrot.slane %v317_v20, 2  ;;  %v296_v33 = vadd.f32 %v295_v26, %v294_v17  ;;  %v309_v43 = vrot.slane %v308_v36, 4  ;;  %v287_v47 = vadd.f32 %v282_v41, %v281_v40  ;;  %v2211_v17 = vld [vmem:[%s2720_s4] sm:$0xff] }
  0x28   : > { %v325_v27 = vrot.slane %v324_v22, 2  ;;  %v303_v46 = vadd.f32 %v302_v39, %v301_v29 }
  0x29   : > { %v319_v28 = vadd.f32 %v318_v25, %v317_v20  ;;  %v297_v38 = vrot.slane %v296_v33, 2  ;;  %v310_v48 = vadd.f32 %v309_v43, %v308_v36  ;;  %v288_v51 = vrot.slane %v287_v47, 4  ;;  %v401_v20 = vld [vmem:[%s2201_s13 + $0x28] sm:$0xff] }
  0x2a   : > { %v326_v32 = vadd.f32 %v325_v27, %v324_v22  ;;  %v304_v50 = vrot.slane %v303_v46, 2 }
  0x2b   : > { %v320_v31 = vrot.slane %v319_v28, 1  ;;  %v298_v45 = vadd.f32 %v297_v38, %v296_v33  ;;  %v311_v52 = vrot.slane %v310_v48, 2  ;;  %v289_v55 = vadd.f32 %v288_v51, %v287_v47 }
  0x2c   : > { %v327_v37 = vrot.slane %v326_v32, 1  ;;  %v305_v54 = vadd.f32 %v304_v50, %v303_v46 }
  0x2d   : > { %v321_v35 = vadd.f32 %v320_v31, %v319_v28  ;;  %v299_v49 = vrot.slane %v298_v45, 1  ;;  %v312_v56 = vadd.f32 %v311_v52, %v310_v48  ;;  %v290_v58 = vrot.slane %v289_v55, 2 }
  0x2e   : > { %v328_v44 = vadd.f32 %v327_v37, %v326_v32  ;;  %v306_v57 = vrot.slane %v305_v54, 1 }
  0x2f   : > { %337 = vadd.xlane.f32.xlu2 %v321_v35  ;;  %v300_v53 = vadd.f32 %v299_v49, %v298_v45  ;;  %v313_v59 = vrot.slane %v312_v56, 1  ;;  %v291_v61 = vadd.f32 %v290_v58, %v289_v55 }
  0x30   : > { %v307_v60 = vadd.f32 %v306_v57, %v305_v54 }
  0x31   : > { %v314_v62 = vadd.f32 %v313_v59, %v312_v56  ;;  %v292_v63 = vrot.slane %v291_v61, 1 }
  0x33   : > { %v293_v1 = vadd.f32 %v292_v63, %v291_v61 }
  0x37   : > { %339 = vadd.xlane.f32.xlu2 %v328_v44 }
  0x3f   : > { %331 = vadd.xlane.f32.xlu2 %v300_v53 }
  0x47   : > { %333 = vadd.xlane.f32.xlu2 %v307_v60 }
  0x4a   : > { %335 = vadd.xlane.f32.xlu1 %v314_v62 }
  0x4f   : > { %s2223_s18 = spop %1803 }
  0x50   : > { %329 = vadd.xlane.f32.xlu0 %v293_v1 }
  0x5f   : > { %419 = vperm.xlu2 %1890, %v396_v10  }
  0x63   : > { %424 = vperm.xlu1 %1891, %v397_v12  }
  0x64   : > { %453 = vperm.xlu0 %1892, %v399_v13  }
  0x67   : > { %448 = vperm.xlu2 %1890, %v398_v15  }
  0x6f   : > { %470 = vperm.xlu2 %1890, %v400_v16  }
  0x77   : > { %475 = vperm.xlu2 %1890, %v401_v20  }
  0x90   : > { %v409_v22 = vpop.permute.xlu0 %408 }
  0x91   : > { %1805 = vpush %v409_v22 }
  0x92   : > { %1807 = vpush %v431_v14  ;;  %v462_v24 = vpop.permute.xlu1 %461 }
  0x98   : > { %v438_v23 = vpop.permute.xlu0 %437 }
  0x99   : > { %1809 = vpush %v438_v23 }
  0x9a   : > { %1811 = vpush %v462_v24 }
  0xa2   : > { %v338_v25 = vpop.xlane.xlu2 %337 }
  0xa3   : > { %v342_v26 = vadd.f32 1e-05, %v338_v25 }
  0xa5   : > { %v370_v47 = vand.u32 2147483648, %v342_v26  ;;  %vm364_vm10 = vweird.f32 %v342_v26  ;;  %v368_v48 = vand.u32 2147483647, %v342_v26 }
  0xa7   : > { %v371_v54 = vor.u32 1.1754944e-38, %v370_v47  ;;  %vm369_vm13 = vcmp.eq.f32.partialorder %v368_v48, 8.507059e+37 }
  0xaa   : > { %v340_v27 = vpop.xlane.xlu2 %339 }
  0xab   : > { %v343_v28 = vadd.f32 1e-05, %v340_v27 }
  0xad   : > { %1893 = vrcp.f32 %v343_v28  ;;  %v385_v43 = vand.u32 2147483648, %v343_v28  ;;  %vm379_vm8 = vweird.f32 %v343_v28  ;;  %v383_v46 = vand.u32 2147483647, %v343_v28 }
  0xae   : > { %1895 = vrcp.f32 %v342_v26 }
  0xaf   : > { %v386_v51 = vor.u32 1.1754944e-38, %v385_v43  ;;  %vm384_vm12 = vcmp.eq.f32.partialorder %v383_v46, 8.507059e+37 }
  0xb2   : > { %v332_v29 = vpop.xlane.xlu2 %331 }
  0xb3   : > { %v1894_v31 = vpop.eup %1893 }
  0xb4   : > { %v1896_v32 = vpop.eup %1895  ;;  %v375_v33 = vmul.f32 %v1894_v31, %v343_v28  ;;  %vm380_vm6 = vweird.f32 %v1894_v31  ;;  %v404_v28 = vstv %s2223_s18 }
  0xb5   : > { %v360_v35 = vmul.f32 %v1896_v32, %v342_v26  ;;  %vm365_vm7 = vweird.f32 %v1896_v32  ;;  %vm381_vm9 = vmor %vm379_vm8, %vm380_vm6 }
  0xb6   : > { %v376_v36 = vsub.f32 1.0, %v375_v33  ;;  %vm366_vm11 = vmor %vm364_vm10, %vm365_vm7 }
  0xb7   : > { %v361_v38 = vsub.f32 1.0, %v360_v35 }
  0xb8   : > { %v377_v0 = vmul.f32 %v1894_v31, %v376_v36 }
  0xb9   : > { %v362_v40 = vmul.f32 %v1896_v32, %v361_v38 }
  0xba   : > { %v334_v37 = vpop.xlane.xlu2 %333  ;;  %v378_v41 = vadd.f32 %v1894_v31, %v377_v0 }
  0xbb   : > { %v363_v45 = vadd.f32 %v1896_v32, %v362_v40 }
  0xbc   : > { %v382_v49 = vsel %vm381_vm9, %v1894_v31, %v378_v41 }
  0xbd   : > { %v336_v14 = vpop.xlane.xlu1 %335  ;;  %v367_v52 = vsel %vm366_vm11, %v1896_v32, %v363_v45  ;;  %v387_v55 = vsel %vm384_vm12, %v386_v51, %v382_v49 }
  0xbe   : > { %v341_v39 = vadd.f32 1e-05, %v336_v14  ;;  %v372_v57 = vsel %vm369_vm13, %v371_v54, %v367_v52  ;;  %v388_v60 = vmul.f32 %v387_v55, %v334_v37 }
  0xbf   : > { %v373_v1 = vmul.f32 %v372_v57, %v332_v29 }
  0xc0   : > { %1897 = vrcp.f32 %v341_v39  ;;  %v355_v58 = vand.u32 2147483648, %v341_v39  ;;  %v353_v62 = vand.u32 2147483647, %v341_v39  ;;  %vm349_vm15 = vweird.f32 %v341_v39 }
  0xc1   : > { %v393_v15 = vsub.f32 %v2134_v4, %v388_v60  ;;  %v391_v26 = vsub.f32 %v2128_v2, %v373_v1  ;;  %v392_v27 = vsub.f32 %v2131_v3, %v373_v1  ;;  %v394_v3 = vsub.f32 %v2140_v5, %v388_v60 }
  0xc2   : > { %v2221_v44 = vpop.permute.xlu2 %419  ;;  %s2225_s19 = spop %1805  ;;  %v356_v10 = vor.u32 1.1754944e-38, %v355_v58  ;;  %vm354_vm1 = vcmp.eq.f32.partialorder %v353_v62, 8.507059e+37 }
  0xc3   : > { %s2227_s28 = spop %1807  ;;  %v330_v12 = vpop.xlane.xlu0 %329  ;;  %v411_v22 = vstv %s2225_s19 }
  0xc4   : > { %v433_v29 = vstv %s2227_s28  ;;  %v413_v4 = vmul.f32 %v411_v22, %v391_v26  ;;  %v414_v40 = vmul.f32 %v411_v22, %v392_v27 }
  0xc6   : > { %v1898_v50 = vpop.eup %1897 }
  0xc7   : > { %v345_v53 = vmul.f32 %v1898_v50, %v341_v39  ;;  %vm350_vm14 = vweird.f32 %v1898_v50 }
  0xc8   : > { %vm351_vm0 = vmor %vm349_vm15, %vm350_vm14 }
  0xc9   : > { %v346_v56 = vsub.f32 1.0, %v345_v53 }
  0xca   : > { %s2229_s29 = spop %1809  ;;  %v449_v59 = vpop.permute.xlu2 %448 }
  0xcb   : > { %v347_v61 = vmul.f32 %v1898_v50, %v346_v56  ;;  %s2231_s11 = spop %1811  ;;  %v440_v24 = vstv %s2229_s29 }
  0xcc   : > { %v464_v13 = vstv %s2231_s11  ;;  %v442_v36 = vmul.f32 %v440_v24, %v391_v26  ;;  %v443_v37 = vmul.f32 %v440_v24, %v392_v27 }
  0xcd   : > { %v348_v63 = vadd.f32 %v1898_v50, %v347_v61  ;;  %v466_v25 = vmul.f32 %v464_v13, %v393_v15  ;;  %v467_v48 = vmul.f32 %v464_v13, %v394_v3 }
  0xcf   : > { %v352_v16 = vsel %vm351_vm0, %v1898_v50, %v348_v63 }
  0xd0   : > { %v357_v20 = vsel %vm354_vm1, %v356_v10, %v352_v16 }
  0xd1   : > { %v358_v23 = vmul.f32 %v357_v20, %v330_v12 }
  0xd2   : > { %v471_v31 = vpop.permute.xlu2 %470 }
  0xd3   : > { %v389_v32 = vsub.f32 %v2167_v19, %v358_v23  ;;  %v390_v33 = vsub.f32 %v2170_v21, %v358_v23  ;;  %v478_v35 = vadd.f32 %v471_v31, %v466_v25 }
  0xd5   : > { %v406_v38 = vmul.f32 %v404_v28, %v389_v32  ;;  %v435_v0 = vmul.f32 %v433_v29, %v389_v32  ;;  %v436_v14 = vmul.f32 %v433_v29, %v390_v33  ;;  %v480_v39 = vmul.f32 %v478_v35, %v2152_v9  ;;  %v425_v19 = vpop.permute.xlu1 %424 }
  0xd6   : > { %v407_v2 = vmul.f32 %v404_v28, %v390_v33  ;;  %v454_v41 = vpop.permute.xlu0 %453 }
  0xd7   : > { %v415_v43 = vadd.f32 %v413_v4, %v406_v38  ;;  %v444_v45 = vadd.f32 %v442_v36, %v435_v0  ;;  %v445_v46 = vadd.f32 %v443_v37, %v436_v14 }
  0xd8   : > { %v416_v21 = vadd.f32 %v414_v40, %v407_v2 }
  0xd9   : > { %v427_v47 = vadd.f32 %v2221_v44, %v415_v43  ;;  %v456_v49 = vadd.f32 %v449_v59, %v444_v45  ;;  %v457_v50 = vadd.f32 %v454_v41, %v445_v46  ;;  %484 = sbr.rel (%p1673_p11) target bundleno = 367 (0x16f), region = 40 }
  0xda   : > { %v428_v51 = vadd.f32 %v425_v19, %v416_v21  ;;  %v476_v52 = vpop.permute.xlu2 %475 }
  0xdb   : > { %v429_v9 = vmul.f32 %v427_v47, %v2182_v30  ;;  %v458_v53 = vmul.f32 %v456_v49, %v2145_v7  ;;  %v459_v54 = vmul.f32 %v457_v50, %v2148_v8  ;;  %v479_v5 = vadd.f32 %v476_v52, %v467_v48 }
  0xdc   : > { %v430_v55 = vmul.f32 %v428_v51, %v2185_v34 }
  0xdd   : > { %v481_v56 = vmul.f32 %v479_v5, %v2157_v11 }
  0xde   : > { %vm485_vm2 = vcmask 130048   ;;  %531 = vmatpush.msra.mxu1 %v459_v54  ;;  %1793 = vmatpush.msra.mxu3 %v430_v55 }
  0xdf   : > { %557 = vmatpush.msra.mxu2 %v481_v56  ;;  %506 = vmatpush.msra.mxu0 %v430_v55 }
  0xe0   : > { %532 = vmatpush.msra.mxu1 %v458_v53  ;;  %1794 = vmatpush.msra.mxu3 %v429_v9 }
  0xe1   : > { %558 = vmatpush.msra.mxu2 %v480_v39  ;;  %1676 = vmatmul.msk.f32.vlgmr.msra.gmra.mxu1 %vm485_vm2, %v2211_v17 }
  0xe2   : > { %1680 = vmatmul.msk.f32.vlgmr.msra.gmra.mxu2 %vm485_vm2, %v2211_v17  ;;  %507 = vmatpush.msra.mxu0 %v429_v9 }
  0xe3   : > { %1675 = vmatmul.msk.f32.vlgmr.msra.gmra.mxu3 %vm485_vm2, %v2216_v18  ;;  %1674 = vmatmul.msk.f32.vlgmr.msra.gmra.mxu0 %vm485_vm2, %v2211_v17 }
  0xe9   : > { %1677 = vmatmul.msk.f32.gmra.mxu1 %vm485_vm2, %v2216_v18 }
  0xea   : > { %1681 = vmatmul.msk.f32.gmra.mxu2 %vm485_vm2, %v2216_v18 }
 0x15e   : > { %v534_v7 = vpop.f32.mrf.mxu1 }
 0x15f   : > { %1678 = vst [vmem:[%s2252_s15 + $0x10] sm:$0xff] %v534_v7 }
 0x160   : > { %v509_v8 = vpop.f32.mrf.mxu0 }
 0x161   : > { %515 = vst [vmem:[%s2252_s15] sm:$0xff] %v509_v8 }
 0x165   : > { %v560_v11 = vpop.f32.mrf.mxu2 }
 0x166   : > { %1682 = vst [vmem:[%s2252_s15 + $0x20] sm:$0xff] %v560_v11  ;;  %v512_v30 = vpop.f32.mrf.mxu3  ;;  %v537_v34 = vpop.f32.mrf.mxu1 }
 0x167   : > { %516 = vst [vmem:[%s2252_s15 + $0x8] sm:$0xff] %v512_v30 }
 0x168   : > { %1679 = vst [vmem:[%s2252_s15 + $0x18] sm:$0xff] %v537_v34 }
 0x16d   : > { %v563_v44 = vpop.f32.mrf.mxu2 }
 0x16e   : > { %1683 = vst [vmem:[%s2252_s15 + $0x28] sm:$0xff] %v563_v44 }
 0x16f PF: > { %p1684_p12 = scmp.ne.s32.totalorder %s2097_s9, 0 }
 0x171   : > { %572 = sbr.rel (%p1684_p12) target bundleno = 380 (0x17c), region = 44 }
 0x176   : > { %573 = vst [vmem:[%s2252_s15] sm:$0xff] %v429_v9 }
 0x177   : > { %574 = vst [vmem:[%s2252_s15 + $0x8] sm:$0xff] %v430_v55 }
 0x178   : > { %1685 = vst [vmem:[%s2252_s15 + $0x10] sm:$0xff] %v458_v53 }
 0x179   : > { %1686 = vst [vmem:[%s2252_s15 + $0x18] sm:$0xff] %v459_v54 }
 0x17a   : > { %1687 = vst [vmem:[%s2252_s15 + $0x20] sm:$0xff] %v480_v39 }
 0x17b   : > { %1688 = vst [vmem:[%s2252_s15 + $0x28] sm:$0xff] %v481_v56 }
 0x17c PF: > { %v2275_v57 = vld [vmem:[%s2112_s17 + $0x4] sm:$0x7]  ;;  %v2281_v59 = vld [vmem:[%s2122_s20 + $0x48] sm:$0xff]  ;;  %1899 = vset.pattern.permute.xlu2 %v2008_v42  ;;  %1901 = vset.pattern.permute.xlu0 %v2008_v42  ;;  %s581_s9 = sadd.s32 1, %s2093_s8  ;;  %v2292_v61 = vld [vmem:[%s2122_s20 + $0x50] sm:$0xff] }
 0x17d   : > { %v2278_v58 = vld [vmem:[%s2122_s20 + $0x40] sm:$0xff]  ;;  %732 = vrot.lane.b32.xlu0 %v2275_v57, %s2005_s21  ;;  %v784_v60 = vrot.slane %v2275_v57, 2  ;;  %vm594_vm4 = vcmp.eq.f32.partialorder %v2281_v59, 0.0  ;;  %v2295_v62 = vld [vmem:[%s2122_s20 + $0x58] sm:$0xff]  ;;  %1900 = vset.pattern.permute.xlu1 %v2008_v42  ;;  %1813 = vpush %v2275_v57  ;;  %vm595_vm5 = vcmp.eq.f32.partialorder %v2292_v61, 0.0  ;;  %s2318_s12 = sld [smem:[#allocation3 + %s581_s9]] }
 0x17e   : > { %vm593_vm3 = vcmp.eq.f32.partialorder %v2278_v58, 0.0  ;;  %v2303_v1 = vsel %vm594_vm4, 0.0, %v2007_v6  ;;  %vm596_vm6 = vcmp.eq.f32.partialorder %v2295_v62, 0.0  ;;  %v2311_v12 = vsel %vm595_vm5, 0.0, %v2007_v6  ;;  %v2326_v28 = vld [vmem:[%s2122_s20 + $0x30] sm:$0xff]  ;;  %v2329_v29 = vld [vmem:[%s2122_s20 + $0x38] sm:$0xff] }
 0x17f   : > { %v2300_v63 = vsel %vm593_vm3, 0.0, %v2007_v6  ;;  %785 = vrot.lane.b32.xlu1 %v784_v60, %s2006_s26  ;;  %v2314_v13 = vsel %vm596_vm6, 0.0, %v2007_v6  ;;  %v606_v20 = vmul.f32 %v2281_v59, %v2303_v1  ;;  %v755_v22 = vrot.slane %v2275_v57, 1 }
 0x180   : > { %v637_v10 = vadd.f32 %v2303_v1, %v2300_v63  ;;  %v605_v15 = vmul.f32 %v2278_v58, %v2300_v63  ;;  %v644_v16 = vadd.f32 %v2314_v13, %v2311_v12  ;;  %v607_v33 = vmul.f32 %v2292_v61, %v2311_v12 }
 0x181   : > { %v608_v35 = vmul.f32 %v2295_v62, %v2314_v13  ;;  %vm591_vm7 = vcmp.eq.f32.partialorder %v2326_v28, 0.0  ;;  %vm592_vm8 = vcmp.eq.f32.partialorder %v2329_v29, 0.0 }
 0x182   : > { %v638_v23 = vrot.slane %v637_v10, 4  ;;  %v645_v24 = vrot.slane %v644_v16, 4  ;;  %v616_v25 = vadd.f32 %v606_v20, %v605_v15  ;;  %v2341_v39 = vsel %vm591_vm7, 0.0, %v2007_v6  ;;  %v1697_v20 = vld [vmem:[%s2201_s13 + $0x38] sm:$0xff] }
 0x183   : > { %v623_v14 = vadd.f32 %v608_v35, %v607_v33  ;;  %v2344_v40 = vsel %vm592_vm8, 0.0, %v2007_v6  ;;  %v603_v19 = vmul.f32 %v2326_v28, %v2341_v39  ;;  %p1702_p13 = scmp.eq.s32.totalorder %s2318_s12, 0 }
 0x184   : > { %v639_v26 = vadd.f32 %v638_v23, %v637_v10  ;;  %v646_v27 = vadd.f32 %v645_v24, %v644_v16  ;;  %v617_v32 = vrot.slane %v616_v25, 4  ;;  %v630_v45 = vadd.f32 %v2344_v40, %v2341_v39  ;;  %v1696_v16 = vld [vmem:[%s2201_s13 + $0x30] sm:$0xff]  ;;  %v1699_v23 = vld [vmem:[%s2201_s13 + $0x48] sm:$0xff]  ;;  %v1698_v24 = vld [vmem:[%s2201_s13 + $0x40] sm:$0xff] }
 0x185   : > { %761 = vrot.lane.b32.xlu0 %v755_v22, %s2005_s21  ;;  %v624_v43 = vrot.slane %v623_v14, 4  ;;  %v604_v46 = vmul.f32 %v2329_v29, %v2344_v40 }
 0x186   : > { %v640_v31 = vrot.slane %v639_v26, 2  ;;  %v647_v4 = vrot.slane %v646_v27, 2  ;;  %v618_v0 = vadd.f32 %v617_v32, %v616_v25  ;;  %v631_v49 = vrot.slane %v630_v45, 4  ;;  %v1700_v25 = vld [vmem:[%s2201_s13 + $0x50] sm:$0xff] }
 0x187   : > { %v625_v48 = vadd.f32 %v624_v43, %v623_v14  ;;  %v609_v50 = vadd.f32 %v604_v46, %v603_v19 }
 0x188   : > { %v641_v36 = vadd.f32 %v640_v31, %v639_v26  ;;  %v648_v38 = vadd.f32 %v647_v4, %v646_v27  ;;  %v619_v3 = vrot.slane %v618_v0, 2  ;;  %v632_v9 = vadd.f32 %v631_v49, %v630_v45  ;;  %v1701_v26 = vld [vmem:[%s2201_s13 + $0x58] sm:$0xff] }
 0x189   : > { %v626_v52 = vrot.slane %v625_v48, 2  ;;  %v610_v53 = vrot.slane %v609_v50, 4 }
 0x18a   : > { %v642_v37 = vrot.slane %v641_v36, 1  ;;  %v649_v41 = vrot.slane %v648_v38, 1  ;;  %v620_v47 = vadd.f32 %v619_v3, %v618_v0  ;;  %v633_v55 = vrot.slane %v632_v9, 2 }
 0x18b   : > { %v627_v5 = vadd.f32 %v626_v52, %v625_v48  ;;  %v611_v56 = vadd.f32 %v610_v53, %v609_v50 }
 0x18c   : > { %v643_v2 = vadd.f32 %v642_v37, %v641_v36  ;;  %v650_v21 = vadd.f32 %v649_v41, %v648_v38  ;;  %v621_v51 = vrot.slane %v620_v47, 1  ;;  %v634_v8 = vadd.f32 %v633_v55, %v632_v9 }
 0x18d   : > { %v628_v7 = vrot.slane %v627_v5, 1  ;;  %v612_v11 = vrot.slane %v611_v56, 2 }
 0x18e   : > { %659 = vadd.xlane.f32.xlu2 %v643_v2  ;;  %v622_v54 = vadd.f32 %v621_v51, %v620_v47  ;;  %v635_v34 = vrot.slane %v634_v8, 1 }
 0x18f   : > { %v629_v30 = vadd.f32 %v628_v7, %v627_v5  ;;  %v613_v44 = vadd.f32 %v612_v11, %v611_v56 }
 0x190   : > { %v636_v60 = vadd.f32 %v635_v34, %v634_v8 }
 0x191   : > { %v614_v10 = vrot.slane %v613_v44, 1 }
 0x193   : > { %v615_v15 = vadd.f32 %v614_v10, %v613_v44 }
 0x196   : > { %661 = vadd.xlane.f32.xlu2 %v650_v21 }
 0x19e   : > { %653 = vadd.xlane.f32.xlu2 %v622_v54 }
 0x1a6   : > { %655 = vadd.xlane.f32.xlu2 %v629_v30 }
 0x1a9   : > { %657 = vadd.xlane.f32.xlu1 %v636_v60 }
 0x1ae   : > { %s2362_s14 = spop %1813 }
 0x1af   : > { %651 = vadd.xlane.f32.xlu0 %v615_v15 }
 0x1be   : > { %743 = vperm.xlu2 %1899, %v1696_v16  }
 0x1c2   : > { %748 = vperm.xlu1 %1900, %v1697_v20  }
 0x1c3   : > { %777 = vperm.xlu0 %1901, %v1699_v23  }
 0x1c6   : > { %772 = vperm.xlu2 %1899, %v1698_v24  }
 0x1ce   : > { %794 = vperm.xlu2 %1899, %v1700_v25  }
 0x1d6   : > { %799 = vperm.xlu2 %1899, %v1701_v26  }
 0x1ef   : > { %v733_v27 = vpop.permute.xlu0 %732 }
 0x1f0   : > { %1815 = vpush %v733_v27 }
 0x1f1   : > { %1817 = vpush %v755_v22  ;;  %v786_v32 = vpop.permute.xlu1 %785 }
 0x1f7   : > { %v762_v31 = vpop.permute.xlu0 %761 }
 0x1f8   : > { %1819 = vpush %v762_v31 }
 0x1f9   : > { %1821 = vpush %v786_v32 }
 0x201   : > { %v660_v33 = vpop.xlane.xlu2 %659 }
 0x202   : > { %v664_v4 = vadd.f32 1e-05, %v660_v33 }
 0x204   : > { %v692_v50 = vand.u32 2147483648, %v664_v4  ;;  %vm686_vm13 = vweird.f32 %v664_v4  ;;  %v690_v52 = vand.u32 2147483647, %v664_v4 }
 0x206   : > { %v693_v56 = vor.u32 1.1754944e-38, %v692_v50  ;;  %vm691_vm0 = vcmp.eq.f32.partialorder %v690_v52, 8.507059e+37 }
 0x209   : > { %v662_v35 = vpop.xlane.xlu2 %661 }
 0x20a   : > { %v665_v36 = vadd.f32 1e-05, %v662_v35 }
 0x20c   : > { %1902 = vrcp.f32 %v665_v36  ;;  %v707_v21 = vand.u32 2147483648, %v665_v36  ;;  %vm701_vm10 = vweird.f32 %v665_v36  ;;  %v705_v48 = vand.u32 2147483647, %v665_v36 }
 0x20d   : > { %1904 = vrcp.f32 %v664_v4 }
 0x20e   : > { %v708_v9 = vor.u32 1.1754944e-38, %v707_v21  ;;  %vm706_vm15 = vcmp.eq.f32.partialorder %v705_v48, 8.507059e+37 }
 0x211   : > { %v654_v37 = vpop.xlane.xlu2 %653 }
 0x212   : > { %v1903_v38 = vpop.eup %1902 }
 0x213   : > { %v1905_v0 = vpop.eup %1904  ;;  %v697_v14 = vmul.f32 %v1903_v38, %v665_v36  ;;  %vm702_vm9 = vweird.f32 %v1903_v38 }
 0x214   : > { %v682_v2 = vmul.f32 %v1905_v0, %v664_v4  ;;  %vm687_vm11 = vweird.f32 %v1905_v0  ;;  %vm703_vm12 = vmor %vm701_vm10, %vm702_vm9 }
 0x215   : > { %v698_v41 = vsub.f32 1.0, %v697_v14  ;;  %vm688_vm14 = vmor %vm686_vm13, %vm687_vm11 }
 0x216   : > { %v683_v43 = vsub.f32 1.0, %v682_v2 }
 0x217   : > { %v699_v57 = vmul.f32 %v1903_v38, %v698_v41 }
 0x218   : > { %v684_v19 = vmul.f32 %v1905_v0, %v683_v43 }
 0x219   : > { %v656_v3 = vpop.xlane.xlu2 %655  ;;  %v700_v46 = vadd.f32 %v1903_v38, %v699_v57 }
 0x21a   : > { %v685_v49 = vadd.f32 %v1905_v0, %v684_v19 }
 0x21b   : > { %v704_v51 = vsel %vm703_vm12, %v1903_v38, %v700_v46 }
 0x21c   : > { %v658_v22 = vpop.xlane.xlu1 %657  ;;  %v689_v54 = vsel %vm688_vm14, %v1905_v0, %v685_v49  ;;  %v709_v5 = vsel %vm706_vm15, %v708_v9, %v704_v51 }
 0x21d   : > { %v663_v45 = vadd.f32 1e-05, %v658_v22  ;;  %v694_v11 = vsel %vm691_vm0, %v693_v56, %v689_v54  ;;  %v710_v30 = vmul.f32 %v709_v5, %v656_v3 }
 0x21e   : > { %v695_v10 = vmul.f32 %v694_v11, %v654_v37  ;;  %v728_v37 = vstv %s2362_s14 }
 0x21f   : > { %1906 = vrcp.f32 %v663_v45  ;;  %v677_v34 = vand.u32 2147483648, %v663_v45  ;;  %v675_v60 = vand.u32 2147483647, %v663_v45  ;;  %vm671_vm2 = vweird.f32 %v663_v45 }
 0x220   : > { %v715_v20 = vsub.f32 %v2292_v61, %v710_v30  ;;  %v713_v32 = vsub.f32 %v2278_v58, %v695_v10  ;;  %v714_v36 = vsub.f32 %v2281_v59, %v695_v10  ;;  %v716_v46 = vsub.f32 %v2295_v62, %v710_v30 }
 0x221   : > { %v2360_v47 = vpop.permute.xlu2 %743  ;;  %s2364_s16 = spop %1815  ;;  %v678_v23 = vor.u32 1.1754944e-38, %v677_v34  ;;  %vm676_vm4 = vcmp.eq.f32.partialorder %v675_v60, 8.507059e+37 }
 0x222   : > { %s2366_s18 = spop %1817  ;;  %v652_v24 = vpop.xlane.xlu0 %651  ;;  %v735_v26 = vstv %s2364_s16 }
 0x223   : > { %v757_v38 = vstv %s2366_s18  ;;  %v737_v14 = vmul.f32 %v735_v26, %v713_v32  ;;  %v738_v41 = vmul.f32 %v735_v26, %v714_v36 }
 0x225   : > { %v1907_v53 = vpop.eup %1906 }
 0x226   : > { %v667_v55 = vmul.f32 %v1907_v53, %v663_v45  ;;  %vm672_vm1 = vweird.f32 %v1907_v53 }
 0x227   : > { %vm673_vm3 = vmor %vm671_vm2, %vm672_vm1 }
 0x228   : > { %v668_v7 = vsub.f32 1.0, %v667_v55 }
 0x229   : > { %v773_v8 = vpop.permute.xlu2 %772  ;;  %s2368_s19 = spop %1819 }
 0x22a   : > { %v669_v44 = vmul.f32 %v1907_v53, %v668_v7  ;;  %s2370_s28 = spop %1821  ;;  %v764_v35 = vstv %s2368_s19 }
 0x22b   : > { %v788_v16 = vstv %s2370_s28  ;;  %v766_v3 = vmul.f32 %v764_v35, %v713_v32  ;;  %v767_v43 = vmul.f32 %v764_v35, %v714_v36 }
 0x22c   : > { %v670_v15 = vadd.f32 %v1907_v53, %v669_v44  ;;  %v790_v31 = vmul.f32 %v788_v16, %v715_v20 }
 0x22e   : > { %v674_v25 = vsel %vm673_vm3, %v1907_v53, %v670_v15 }
 0x22f   : > { %v679_v27 = vsel %vm676_vm4, %v678_v23, %v674_v25 }
 0x230   : > { %v680_v33 = vmul.f32 %v679_v27, %v652_v24 }
 0x231   : > { %v795_v4 = vpop.permute.xlu2 %794 }
 0x232   : > { %v802_v0 = vadd.f32 %v795_v4, %v790_v31  ;;  %v711_v61 = vsub.f32 %v2326_v28, %v680_v33  ;;  %v712_v2 = vsub.f32 %v2329_v29, %v680_v33  ;;  %v791_v28 = vmul.f32 %v788_v16, %v716_v46 }
 0x234   : > { %v804_v57 = vmul.f32 %v802_v0, %v2311_v12  ;;  %v730_v22 = vmul.f32 %v728_v37, %v711_v61  ;;  %v759_v58 = vmul.f32 %v757_v38, %v711_v61  ;;  %v760_v45 = vmul.f32 %v757_v38, %v712_v2  ;;  %v749_v59 = vpop.permute.xlu1 %748 }
 0x235   : > { %v731_v19 = vmul.f32 %v728_v37, %v712_v2  ;;  %v778_v21 = vpop.permute.xlu0 %777 }
 0x236   : > { %v739_v48 = vadd.f32 %v737_v14, %v730_v22  ;;  %v768_v49 = vadd.f32 %v766_v3, %v759_v58  ;;  %v769_v51 = vadd.f32 %v767_v43, %v760_v45 }
 0x237   : > { %v740_v50 = vadd.f32 %v738_v41, %v731_v19 }
 0x238   : > { %v751_v29 = vadd.f32 %v2360_v47, %v739_v48  ;;  %v780_v52 = vadd.f32 %v773_v8, %v768_v49  ;;  %v781_v53 = vadd.f32 %v778_v21, %v769_v51  ;;  %808 = sbr.rel (%p1702_p13) target bundleno = 718 (0x2ce), region = 48 }
 0x239   : > { %v752_v9 = vadd.f32 %v749_v59, %v740_v50  ;;  %v800_v54 = vpop.permute.xlu2 %799 }
 0x23a   : > { %v803_v12 = vadd.f32 %v800_v54, %v791_v28  ;;  %v753_v5 = vmul.f32 %v751_v29, %v2341_v39  ;;  %v782_v55 = vmul.f32 %v780_v52, %v2300_v63  ;;  %v783_v56 = vmul.f32 %v781_v53, %v2303_v1 }
 0x23b   : > { %v754_v62 = vmul.f32 %v752_v9, %v2344_v40 }
 0x23c   : > { %v805_v7 = vmul.f32 %v803_v12, %v2314_v13 }
 0x23d   : > { %vm809_vm5 = vcmask 130048   ;;  %856 = vmatpush.msra.mxu1 %v783_v56  ;;  %1795 = vmatpush.msra.mxu3 %v754_v62 }
 0x23e   : > { %882 = vmatpush.msra.mxu2 %v805_v7  ;;  %830 = vmatpush.msra.mxu0 %v754_v62 }
 0x23f   : > { %857 = vmatpush.msra.mxu1 %v782_v55  ;;  %1796 = vmatpush.msra.mxu3 %v753_v5 }
 0x240   : > { %883 = vmatpush.msra.mxu2 %v804_v57  ;;  %1707 = vmatmul.msk.f32.vlgmr.msra.gmra.mxu1 %vm809_vm5, %v2211_v17 }
 0x241   : > { %1711 = vmatmul.msk.f32.vlgmr.msra.gmra.mxu2 %vm809_vm5, %v2211_v17  ;;  %831 = vmatpush.msra.mxu0 %v753_v5 }
 0x242   : > { %1704 = vmatmul.msk.f32.vlgmr.msra.gmra.mxu3 %vm809_vm5, %v2216_v18  ;;  %1703 = vmatmul.msk.f32.vlgmr.msra.gmra.mxu0 %vm809_vm5, %v2211_v17 }
 0x248   : > { %1708 = vmatmul.msk.f32.gmra.mxu1 %vm809_vm5, %v2216_v18 }
 0x249   : > { %1712 = vmatmul.msk.f32.gmra.mxu2 %vm809_vm5, %v2216_v18 }
 0x2bd   : > { %v859_v63 = vpop.f32.mrf.mxu1 }
 0x2be   : > { %1709 = vst [vmem:[%s2252_s15 + $0x40] sm:$0xff] %v859_v63 }
 0x2bf   : > { %v833_v1 = vpop.f32.mrf.mxu0 }
 0x2c0   : > { %1705 = vst [vmem:[%s2252_s15 + $0x30] sm:$0xff] %v833_v1 }
 0x2c4   : > { %v885_v13 = vpop.f32.mrf.mxu2 }
 0x2c5   : > { %1713 = vst [vmem:[%s2252_s15 + $0x50] sm:$0xff] %v885_v13  ;;  %v836_v39 = vpop.f32.mrf.mxu3  ;;  %v862_v40 = vpop.f32.mrf.mxu1 }
 0x2c6   : > { %1706 = vst [vmem:[%s2252_s15 + $0x38] sm:$0xff] %v836_v39 }
 0x2c7   : > { %1710 = vst [vmem:[%s2252_s15 + $0x48] sm:$0xff] %v862_v40 }
 0x2cc   : > { %v888_v47 = vpop.f32.mrf.mxu2 }
 0x2cd   : > { %1714 = vst [vmem:[%s2252_s15 + $0x58] sm:$0xff] %v888_v47 }
 0x2ce PF: > { %p1715_p0 = scmp.ne.s32.totalorder %s2318_s12, 0 }
 0x2d0   : > { %897 = sbr.rel (%p1715_p0) target bundleno = 731 (0x2db), region = 52 }
 0x2d5   : > { %1716 = vst [vmem:[%s2252_s15 + $0x30] sm:$0xff] %v753_v5 }
 0x2d6   : > { %1717 = vst [vmem:[%s2252_s15 + $0x38] sm:$0xff] %v754_v62 }
 0x2d7   : > { %1718 = vst [vmem:[%s2252_s15 + $0x40] sm:$0xff] %v782_v55 }
 0x2d8   : > { %1719 = vst [vmem:[%s2252_s15 + $0x48] sm:$0xff] %v783_v56 }
 0x2d9   : > { %1720 = vst [vmem:[%s2252_s15 + $0x50] sm:$0xff] %v804_v57 }
 0x2da   : > { %1721 = vst [vmem:[%s2252_s15 + $0x58] sm:$0xff] %v805_v7 }
 0x2db PF: > { %v2411_v8 = vld [vmem:[%s2112_s17 + $0x8] sm:$0x7]  ;;  %v2414_v11 = vld [vmem:[%s2122_s20 + $0x70] sm:$0xff]  ;;  %v2417_v30 = vld [vmem:[%s2122_s20 + $0x78] sm:$0xff]  ;;  %1908 = vset.pattern.permute.xlu2 %v2008_v42  ;;  %1910 = vset.pattern.permute.xlu0 %v2008_v42  ;;  %s907_s29 = sadd.s32 2, %s2093_s8 }
 0x2dc   : > { %1058 = vrot.lane.b32.xlu0 %v2411_v8, %s2005_s21  ;;  %v1110_v34 = vrot.slane %v2411_v8, 2  ;;  %vm919_vm6 = vcmp.eq.f32.partialorder %v2414_v11, 0.0  ;;  %vm920_vm7 = vcmp.eq.f32.partialorder %v2417_v30, 0.0  ;;  %v2428_v44 = vld [vmem:[%s2122_s20 + $0x80] sm:$0xff]  ;;  %v2431_v60 = vld [vmem:[%s2122_s20 + $0x88] sm:$0xff]  ;;  %1909 = vset.pattern.permute.xlu1 %v2008_v42  ;;  %1823 = vpush %v2411_v8  ;;  %s2454_s11 = sld [smem:[#allocation3 + %s907_s29]] }
 0x2dd   : > { %v2436_v10 = vsel %vm919_vm6, 0.0, %v2007_v6  ;;  %v2439_v15 = vsel %vm920_vm7, 0.0, %v2007_v6  ;;  %vm921_vm8 = vcmp.eq.f32.partialorder %v2428_v44, 0.0  ;;  %vm922_vm9 = vcmp.eq.f32.partialorder %v2431_v60, 0.0  ;;  %v2462_v36 = vld [vmem:[%s2122_s20 + $0x60] sm:$0xff]  ;;  %v2465_v37 = vld [vmem:[%s2122_s20 + $0x68] sm:$0xff] }
 0x2de   : > { %1111 = vrot.lane.b32.xlu1 %v1110_v34, %s2006_s26  ;;  %v963_v16 = vadd.f32 %v2439_v15, %v2436_v10  ;;  %v2447_v20 = vsel %vm921_vm8, 0.0, %v2007_v6  ;;  %v2450_v23 = vsel %vm922_vm9, 0.0, %v2007_v6  ;;  %v931_v24 = vmul.f32 %v2414_v11, %v2436_v10 }
 0x2df   : > { %v970_v25 = vadd.f32 %v2450_v23, %v2447_v20  ;;  %v932_v26 = vmul.f32 %v2417_v30, %v2439_v15  ;;  %v1081_v27 = vrot.slane %v2411_v8, 1  ;;  %v933_v14 = vmul.f32 %v2428_v44, %v2447_v20 }
 0x2e0   : > { %v964_v31 = vrot.slane %v963_v16, 4  ;;  %v934_v61 = vmul.f32 %v2431_v60, %v2450_v23  ;;  %vm917_vm10 = vcmp.eq.f32.partialorder %v2462_v36, 0.0  ;;  %vm918_vm11 = vcmp.eq.f32.partialorder %v2465_v37, 0.0 }
 0x2e1   : > { %v971_v32 = vrot.slane %v970_v25, 4  ;;  %v942_v33 = vadd.f32 %v932_v26, %v931_v24  ;;  %v2477_v58 = vsel %vm917_vm10, 0.0, %v2007_v6  ;;  %v2480_v45 = vsel %vm918_vm11, 0.0, %v2007_v6  ;;  %v1730_v26 = vld [vmem:[%s2201_s13 + $0x68] sm:$0xff] }
 0x2e2   : > { %v965_v35 = vadd.f32 %v964_v31, %v963_v16  ;;  %v949_v22 = vadd.f32 %v934_v61, %v933_v14  ;;  %v956_v48 = vadd.f32 %v2480_v45, %v2477_v58  ;;  %v929_v49 = vmul.f32 %v2462_v36, %v2477_v58  ;;  %v1732_v31 = vld [vmem:[%s2201_s13 + $0x78] sm:$0xff]  ;;  %p1735_p1 = scmp.eq.s32.totalorder %s2454_s11, 0 }
 0x2e3   : > { %v972_v4 = vadd.f32 %v971_v32, %v970_v25  ;;  %v943_v0 = vrot.slane %v942_v33, 4  ;;  %v930_v50 = vmul.f32 %v2465_v37, %v2480_v45  ;;  %v1729_v25 = vld [vmem:[%s2201_s13 + $0x60] sm:$0xff]  ;;  %v1731_v32 = vld [vmem:[%s2201_s13 + $0x70] sm:$0xff] }
 0x2e4   : > { %1087 = vrot.lane.b32.xlu0 %v1081_v27, %s2005_s21  ;;  %v966_v38 = vrot.slane %v965_v35, 2  ;;  %v950_v21 = vrot.slane %v949_v22, 4  ;;  %v957_v52 = vrot.slane %v956_v48, 4 }
 0x2e5   : > { %v973_v2 = vrot.slane %v972_v4, 2  ;;  %v944_v57 = vadd.f32 %v943_v0, %v942_v33  ;;  %v935_v9 = vadd.f32 %v930_v50, %v929_v49  ;;  %v1733_v33 = vld [vmem:[%s2201_s13 + $0x80] sm:$0xff] }
 0x2e6   : > { %v967_v41 = vadd.f32 %v966_v38, %v965_v35  ;;  %v951_v29 = vadd.f32 %v950_v21, %v949_v22  ;;  %v958_v12 = vadd.f32 %v957_v52, %v956_v48  ;;  %v1734_v35 = vld [vmem:[%s2201_s13 + $0x88] sm:$0xff] }
 0x2e7   : > { %v974_v43 = vadd.f32 %v973_v2, %v972_v4  ;;  %v945_v59 = vrot.slane %v944_v57, 2  ;;  %v936_v5 = vrot.slane %v935_v9, 4 }
 0x2e8   : > { %v968_v3 = vrot.slane %v967_v41, 1  ;;  %v952_v54 = vrot.slane %v951_v29, 2  ;;  %v959_v56 = vrot.slane %v958_v12, 2 }
 0x2e9   : > { %v975_v46 = vrot.slane %v974_v43, 1  ;;  %v946_v28 = vadd.f32 %v945_v59, %v944_v57  ;;  %v937_v7 = vadd.f32 %v936_v5, %v935_v9 }
 0x2ea   : > { %v969_v19 = vadd.f32 %v968_v3, %v967_v41  ;;  %v953_v62 = vadd.f32 %v952_v54, %v951_v29  ;;  %v960_v1 = vadd.f32 %v959_v56, %v958_v12 }
 0x2eb   : > { %v976_v51 = vadd.f32 %v975_v46, %v974_v43  ;;  %v947_v53 = vrot.slane %v946_v28, 1  ;;  %v938_v13 = vrot.slane %v937_v7, 2 }
 0x2ec   : > { %985 = vadd.xlane.f32.xlu2 %v969_v19  ;;  %v954_v63 = vrot.slane %v953_v62, 1  ;;  %v961_v40 = vrot.slane %v960_v1, 1 }
 0x2ed   : > { %v948_v55 = vadd.f32 %v947_v53, %v946_v28  ;;  %v939_v47 = vadd.f32 %v938_v13, %v937_v7 }
 0x2ee   : > { %v955_v39 = vadd.f32 %v954_v63, %v953_v62  ;;  %v962_v34 = vadd.f32 %v961_v40, %v960_v1 }
 0x2ef   : > { %v940_v16 = vrot.slane %v939_v47, 1 }
 0x2f1   : > { %v941_v24 = vadd.f32 %v940_v16, %v939_v47 }
 0x2f4   : > { %987 = vadd.xlane.f32.xlu2 %v976_v51 }
 0x2fc   : > { %979 = vadd.xlane.f32.xlu2 %v948_v55 }
 0x304   : > { %981 = vadd.xlane.f32.xlu2 %v955_v39 }
 0x308   : > { %983 = vadd.xlane.f32.xlu1 %v962_v34 }
 0x30d   : > { %s2498_s9 = spop %1823 }
 0x30e   : > { %977 = vadd.xlane.f32.xlu0 %v941_v24 }
 0x31c   : > { %1069 = vperm.xlu2 %1908, %v1729_v25  }
 0x321   : > { %1074 = vperm.xlu1 %1909, %v1730_v26  }
 0x322   : > { %1103 = vperm.xlu0 %1910, %v1732_v31  }
 0x324   : > { %1098 = vperm.xlu2 %1908, %v1731_v32  }
 0x32c   : > { %1120 = vperm.xlu2 %1908, %v1733_v33  }
 0x334   : > { %1125 = vperm.xlu2 %1908, %v1734_v35  }
 0x34e   : > { %v1059_v4 = vpop.permute.xlu0 %1058 }
 0x34f   : > { %1825 = vpush %v1059_v4 }
 0x350   : > { %1827 = vpush %v1081_v27  ;;  %v1112_v0 = vpop.permute.xlu1 %1111 }
 0x356   : > { %v1088_v38 = vpop.permute.xlu0 %1087 }
 0x357   : > { %1829 = vpush %v1088_v38 }
 0x358   : > { %1831 = vpush %v1112_v0 }
 0x35f   : > { %v986_v14 = vpop.xlane.xlu2 %985 }
 0x360   : > { %v990_v2 = vadd.f32 1e-05, %v986_v14 }
 0x362   : > { %v1018_v9 = vand.u32 2147483648, %v990_v2  ;;  %vm1012_vm0 = vweird.f32 %v990_v2  ;;  %v1016_v54 = vand.u32 2147483647, %v990_v2 }
 0x364   : > { %v1019_v7 = vor.u32 1.1754944e-38, %v1018_v9  ;;  %vm1017_vm3 = vcmp.eq.f32.partialorder %v1016_v54, 8.507059e+37 }
 0x367   : > { %v988_v61 = vpop.xlane.xlu2 %987 }
 0x368   : > { %v991_v41 = vadd.f32 1e-05, %v988_v61 }
 0x36a   : > { %1911 = vrcp.f32 %v991_v41  ;;  %v1033_v51 = vand.u32 2147483648, %v991_v41  ;;  %vm1027_vm13 = vweird.f32 %v991_v41  ;;  %v1031_v29 = vand.u32 2147483647, %v991_v41 }
 0x36b   : > { %1913 = vrcp.f32 %v990_v2 }
 0x36c   : > { %v1034_v12 = vor.u32 1.1754944e-38, %v1033_v51  ;;  %vm1032_vm2 = vcmp.eq.f32.partialorder %v1031_v29, 8.507059e+37 }
 0x36f   : > { %v980_v3 = vpop.xlane.xlu2 %979 }
 0x370   : > { %v1912_v43 = vpop.eup %1911 }
 0x371   : > { %v1914_v57 = vpop.eup %1913  ;;  %v1023_v22 = vmul.f32 %v1912_v43, %v991_v41  ;;  %vm1028_vm12 = vweird.f32 %v1912_v43 }
 0x372   : > { %v1008_v19 = vmul.f32 %v1914_v57, %v990_v2  ;;  %vm1013_vm14 = vweird.f32 %v1914_v57  ;;  %vm1029_vm15 = vmor %vm1027_vm13, %vm1028_vm12 }
 0x373   : > { %v1024_v46 = vsub.f32 1.0, %v1023_v22  ;;  %vm1014_vm1 = vmor %vm1012_vm0, %vm1013_vm14 }
 0x374   : > { %v1009_v21 = vsub.f32 1.0, %v1008_v19 }
 0x375   : > { %v1025_v8 = vmul.f32 %v1912_v43, %v1024_v46 }
 0x376   : > { %v1010_v49 = vmul.f32 %v1914_v57, %v1009_v21 }
 0x377   : > { %v982_v59 = vpop.xlane.xlu2 %981  ;;  %v1026_v50 = vadd.f32 %v1912_v43, %v1025_v8 }
 0x378   : > { %v1011_v52 = vadd.f32 %v1914_v57, %v1010_v49 }
 0x379   : > { %v1030_v53 = vsel %vm1029_vm15, %v1912_v43, %v1026_v50 }
 0x37a   : > { %v1015_v55 = vsel %vm1014_vm1, %v1914_v57, %v1011_v52  ;;  %v1035_v62 = vsel %vm1032_vm2, %v1034_v12, %v1030_v53 }
 0x37b   : > { %v984_v27 = vpop.xlane.xlu1 %983  ;;  %v1020_v13 = vsel %vm1017_vm3, %v1019_v7, %v1015_v55  ;;  %v1036_v39 = vmul.f32 %v1035_v62, %v982_v59 }
 0x37c   : > { %v989_v48 = vadd.f32 1e-05, %v984_v27  ;;  %v1021_v16 = vmul.f32 %v1020_v13, %v980_v3  ;;  %v1054_v3 = vstv %s2498_s9 }
 0x37d   : > { %v1041_v26 = vsub.f32 %v2428_v44, %v1036_v39  ;;  %v1042_v50 = vsub.f32 %v2431_v60, %v1036_v39 }
 0x37e   : > { %1915 = vrcp.f32 %v989_v48  ;;  %v1003_v40 = vand.u32 2147483648, %v989_v48  ;;  %v1001_v34 = vand.u32 2147483647, %v989_v48  ;;  %vm997_vm5 = vweird.f32 %v989_v48 }
 0x37f   : > { %v2496_v28 = vpop.permute.xlu2 %1069  ;;  %v1039_v0 = vsub.f32 %v2414_v11, %v1021_v16  ;;  %v1040_v41 = vsub.f32 %v2417_v30, %v1021_v16 }
 0x380   : > { %s2500_s12 = spop %1825  ;;  %v1004_v31 = vor.u32 1.1754944e-38, %v1003_v40  ;;  %vm1002_vm7 = vcmp.eq.f32.partialorder %v1001_v34, 8.507059e+37 }
 0x381   : > { %s2502_s14 = spop %1827  ;;  %v978_v32 = vpop.xlane.xlu0 %977  ;;  %v1061_v35 = vstv %s2500_s12 }
 0x382   : > { %v1083_v43 = vstv %s2502_s14  ;;  %v1063_v22 = vmul.f32 %v1061_v35, %v1039_v0  ;;  %v1064_v46 = vmul.f32 %v1061_v35, %v1040_v41 }
 0x384   : > { %v1916_v5 = vpop.eup %1915 }
 0x385   : > { %v993_v56 = vmul.f32 %v1916_v5, %v989_v48  ;;  %vm998_vm4 = vweird.f32 %v1916_v5 }
 0x386   : > { %vm999_vm6 = vmor %vm997_vm5, %vm998_vm4 }
 0x387   : > { %v994_v63 = vsub.f32 1.0, %v993_v56  ;;  %v1099_v1 = vpop.permute.xlu2 %1098 }
 0x388   : > { %s2504_s16 = spop %1829 }
 0x389   : > { %v995_v47 = vmul.f32 %v1916_v5, %v994_v63  ;;  %s2506_s18 = spop %1831  ;;  %v1090_v61 = vstv %s2504_s16 }
 0x38a   : > { %v1114_v25 = vstv %s2506_s18  ;;  %v1092_v59 = vmul.f32 %v1090_v61, %v1039_v0  ;;  %v1093_v21 = vmul.f32 %v1090_v61, %v1040_v41 }
 0x38b   : > { %v996_v24 = vadd.f32 %v1916_v5, %v995_v47  ;;  %v1116_v38 = vmul.f32 %v1114_v25, %v1041_v26 }
 0x38d   : > { %v1000_v33 = vsel %vm999_vm6, %v1916_v5, %v996_v24 }
 0x38e   : > { %v1005_v4 = vsel %vm1002_vm7, %v1004_v31, %v1000_v33 }
 0x38f   : > { %v1006_v14 = vmul.f32 %v1005_v4, %v978_v32  ;;  %v1121_v2 = vpop.permute.xlu2 %1120 }
 0x390   : > { %v1128_v57 = vadd.f32 %v1121_v2, %v1116_v38 }
 0x391   : > { %v1037_v44 = vsub.f32 %v2462_v36, %v1006_v14  ;;  %v1038_v19 = vsub.f32 %v2465_v37, %v1006_v14  ;;  %v1117_v36 = vmul.f32 %v1114_v25, %v1042_v50 }
 0x392   : > { %v1130_v8 = vmul.f32 %v1128_v57, %v2447_v20 }
 0x393   : > { %v1056_v27 = vmul.f32 %v1054_v3, %v1037_v44  ;;  %v1085_v11 = vmul.f32 %v1083_v43, %v1037_v44  ;;  %v1086_v48 = vmul.f32 %v1083_v43, %v1038_v19  ;;  %v1057_v49 = vmul.f32 %v1054_v3, %v1038_v19  ;;  %v1075_v30 = vpop.permute.xlu1 %1074 }
 0x394   : > { %v1104_v51 = vpop.permute.xlu0 %1103 }
 0x395   : > { %v1065_v29 = vadd.f32 %v1063_v22, %v1056_v27  ;;  %v1094_v52 = vadd.f32 %v1092_v59, %v1085_v11  ;;  %v1066_v9 = vadd.f32 %v1064_v46, %v1057_v49  ;;  %v1095_v53 = vadd.f32 %v1093_v21, %v1086_v48 }
 0x396   : > { %1134 = sbr.rel (%p1735_p1) target bundleno = 1068 (0x42c), region = 56 }
 0x397   : > { %v1077_v37 = vadd.f32 %v2496_v28, %v1065_v29  ;;  %v1106_v54 = vadd.f32 %v1099_v1, %v1094_v52  ;;  %v1078_v12 = vadd.f32 %v1075_v30, %v1066_v9  ;;  %v1107_v5 = vadd.f32 %v1104_v51, %v1095_v53  ;;  %v1126_v55 = vpop.permute.xlu2 %1125 }
 0x398   : > { %v1129_v20 = vadd.f32 %v1126_v55, %v1117_v36 }
 0x399   : > { %v1079_v62 = vmul.f32 %v1077_v37, %v2477_v58  ;;  %v1108_v56 = vmul.f32 %v1106_v54, %v2436_v10  ;;  %v1080_v60 = vmul.f32 %v1078_v12, %v2480_v45  ;;  %v1109_v7 = vmul.f32 %v1107_v5, %v2439_v15 }
 0x39a   : > { %v1131_v63 = vmul.f32 %v1129_v20, %v2450_v23 }
 0x39b   : > { %vm1135_vm8 = vcmask 130048   ;;  %1182 = vmatpush.msra.mxu1 %v1109_v7  ;;  %1797 = vmatpush.msra.mxu3 %v1080_v60 }
 0x39c   : > { %1208 = vmatpush.msra.mxu2 %v1131_v63  ;;  %1156 = vmatpush.msra.mxu0 %v1080_v60 }
 0x39d   : > { %1183 = vmatpush.msra.mxu1 %v1108_v56  ;;  %1798 = vmatpush.msra.mxu3 %v1079_v62 }
 0x39e   : > { %1209 = vmatpush.msra.mxu2 %v1130_v8  ;;  %1740 = vmatmul.msk.f32.vlgmr.msra.gmra.mxu1 %vm1135_vm8, %v2211_v17 }
 0x39f   : > { %1744 = vmatmul.msk.f32.vlgmr.msra.gmra.mxu2 %vm1135_vm8, %v2211_v17  ;;  %1157 = vmatpush.msra.mxu0 %v1079_v62 }
 0x3a0   : > { %1737 = vmatmul.msk.f32.vlgmr.msra.gmra.mxu3 %vm1135_vm8, %v2216_v18  ;;  %1736 = vmatmul.msk.f32.vlgmr.msra.gmra.mxu0 %vm1135_vm8, %v2211_v17 }
 0x3a6   : > { %1741 = vmatmul.msk.f32.gmra.mxu1 %vm1135_vm8, %v2216_v18 }
 0x3a7   : > { %1745 = vmatmul.msk.f32.gmra.mxu2 %vm1135_vm8, %v2216_v18 }
 0x41b   : > { %v1185_v10 = vpop.f32.mrf.mxu1 }
 0x41c   : > { %1742 = vst [vmem:[%s2252_s15 + $0x70] sm:$0xff] %v1185_v10 }
 0x41d   : > { %v1159_v15 = vpop.f32.mrf.mxu0 }
 0x41e   : > { %1738 = vst [vmem:[%s2252_s15 + $0x60] sm:$0xff] %v1159_v15 }
 0x422   : > { %v1211_v23 = vpop.f32.mrf.mxu2 }
 0x423   : > { %1746 = vst [vmem:[%s2252_s15 + $0x80] sm:$0xff] %v1211_v23  ;;  %v1162_v58 = vpop.f32.mrf.mxu3  ;;  %v1188_v45 = vpop.f32.mrf.mxu1 }
 0x424   : > { %1739 = vst [vmem:[%s2252_s15 + $0x68] sm:$0xff] %v1162_v58 }
 0x425   : > { %1743 = vst [vmem:[%s2252_s15 + $0x78] sm:$0xff] %v1188_v45 }
 0x42a   : > { %v1214_v28 = vpop.f32.mrf.mxu2 }
 0x42b   : > { %1747 = vst [vmem:[%s2252_s15 + $0x88] sm:$0xff] %v1214_v28 }
 0x42c PF: > { %p1748_p2 = scmp.ne.s32.totalorder %s2454_s11, 0 }
 0x42e   : > { %1223 = sbr.rel (%p1748_p2) target bundleno = 1081 (0x439), region = 60 }
 0x433   : > { %1749 = vst [vmem:[%s2252_s15 + $0x60] sm:$0xff] %v1079_v62 }
 0x434   : > { %1750 = vst [vmem:[%s2252_s15 + $0x68] sm:$0xff] %v1080_v60 }
 0x435   : > { %1751 = vst [vmem:[%s2252_s15 + $0x70] sm:$0xff] %v1108_v56 }
 0x436   : > { %1752 = vst [vmem:[%s2252_s15 + $0x78] sm:$0xff] %v1109_v7 }
 0x437   : > { %1753 = vst [vmem:[%s2252_s15 + $0x80] sm:$0xff] %v1130_v8 }
 0x438   : > { %1754 = vst [vmem:[%s2252_s15 + $0x88] sm:$0xff] %v1131_v63 }
 0x439 PF: > { %v2547_v1 = vld [vmem:[%s2112_s17 + $0xc] sm:$0x7]  ;;  %v2550_v13 = vld [vmem:[%s2122_s20 + $0xa0] sm:$0xff]  ;;  %1917 = vset.pattern.permute.xlu2 %v2008_v42  ;;  %1919 = vset.pattern.permute.xlu0 %v2008_v42  ;;  %s1233_s19 = sadd.s32 3, %s2093_s8  ;;  %v2564_v47 = vld [vmem:[%s2122_s20 + $0xb0] sm:$0xff] }
 0x43a   : > { %v2553_v39 = vld [vmem:[%s2122_s20 + $0xa8] sm:$0xff]  ;;  %1384 = vrot.lane.b32.xlu0 %v2547_v1, %s2005_s21  ;;  %v1436_v40 = vrot.slane %v2547_v1, 2  ;;  %vm1245_vm9 = vcmp.eq.f32.partialorder %v2550_v13, 0.0  ;;  %v2567_v34 = vld [vmem:[%s2122_s20 + $0xb8] sm:$0xff]  ;;  %1918 = vset.pattern.permute.xlu1 %v2008_v42  ;;  %1833 = vpush %v2547_v1  ;;  %vm1247_vm11 = vcmp.eq.f32.partialorder %v2564_v47, 0.0  ;;  %s2590_s8 = sld [smem:[#allocation3 + %s1233_s19]] }
 0x43b   : > { %vm1246_vm10 = vcmp.eq.f32.partialorder %v2553_v39, 0.0  ;;  %v2572_v16 = vsel %vm1245_vm9, 0.0, %v2007_v6  ;;  %vm1248_vm12 = vcmp.eq.f32.partialorder %v2567_v34, 0.0  ;;  %v2583_v42 = vsel %vm1247_vm11, 0.0, %v2007_v6  ;;  %v2598_v2 = vld [vmem:[%s2122_s20 + $0x90] sm:$0xff]  ;;  %v2601_v41 = vld [vmem:[%s2122_s20 + $0x98] sm:$0xff] }
 0x43c   : > { %v2575_v24 = vsel %vm1246_vm10, 0.0, %v2007_v6  ;;  %1437 = vrot.lane.b32.xlu1 %v1436_v40, %s2006_s26  ;;  %v2586_v26 = vsel %vm1248_vm12, 0.0, %v2007_v6  ;;  %v1257_v31 = vmul.f32 %v2550_v13, %v2572_v16  ;;  %v1407_v35 = vrot.slane %v2547_v1, 1 }
 0x43d   : > { %v1289_v25 = vadd.f32 %v2575_v24, %v2572_v16  ;;  %v1296_v32 = vadd.f32 %v2586_v26, %v2583_v42  ;;  %v1258_v33 = vmul.f32 %v2553_v39, %v2575_v24  ;;  %v1259_v57 = vmul.f32 %v2564_v47, %v2583_v42 }
 0x43e   : > { %v1260_v22 = vmul.f32 %v2567_v34, %v2586_v26  ;;  %vm1243_vm13 = vcmp.eq.f32.partialorder %v2598_v2, 0.0  ;;  %vm1244_vm14 = vcmp.eq.f32.partialorder %v2601_v41, 0.0 }
 0x43f   : > { %v1290_v4 = vrot.slane %v1289_v25, 4  ;;  %v1297_v38 = vrot.slane %v1296_v32, 4  ;;  %v1268_v0 = vadd.f32 %v1258_v33, %v1257_v31  ;;  %v2613_v27 = vsel %vm1243_vm13, 0.0, %v2007_v6  ;;  %v1763_v31 = vld [vmem:[%s2201_s13 + $0x98] sm:$0xff]  ;;  %v1764_v33 = vld [vmem:[%s2201_s13 + $0xa0] sm:$0xff] }
 0x440   : > { %v1275_v8 = vadd.f32 %v1260_v22, %v1259_v57  ;;  %v2616_v11 = vsel %vm1244_vm14, 0.0, %v2007_v6  ;;  %v1255_v29 = vmul.f32 %v2598_v2, %v2613_v27  ;;  %p1768_p3 = scmp.eq.s32.totalorder %s2590_s8, 0 }
 0x441   : > { %v1291_v14 = vadd.f32 %v1290_v4, %v1289_v25  ;;  %v1298_v61 = vadd.f32 %v1297_v38, %v1296_v32  ;;  %v1269_v43 = vrot.slane %v1268_v0, 4  ;;  %v1282_v51 = vadd.f32 %v2616_v11, %v2613_v27  ;;  %v1762_v25 = vld [vmem:[%s2201_s13 + $0x90] sm:$0xff]  ;;  %v1765_v32 = vld [vmem:[%s2201_s13 + $0xa8] sm:$0xff]  ;;  %v1767_v38 = vld [vmem:[%s2201_s13 + $0xb8] sm:$0xff] }
 0x442   : > { %1413 = vrot.lane.b32.xlu0 %v1407_v35, %s2005_s21  ;;  %v1276_v30 = vrot.slane %v1275_v8, 4  ;;  %v1256_v52 = vmul.f32 %v2601_v41, %v2616_v11  ;;  %v1766_v4 = vld [vmem:[%s2201_s13 + $0xb0] sm:$0xff] }
 0x443   : > { %v1292_v3 = vrot.slane %v1291_v14, 2  ;;  %v1299_v44 = vrot.slane %v1298_v61, 2  ;;  %v1270_v21 = vadd.f32 %v1269_v43, %v1268_v0  ;;  %v1283_v37 = vrot.slane %v1282_v51, 4 }
 0x444   : > { %v1277_v36 = vadd.f32 %v1276_v30, %v1275_v8  ;;  %v1261_v6 = vadd.f32 %v1256_v52, %v1255_v29 }
 0x445   : > { %v1293_v19 = vadd.f32 %v1292_v3, %v1291_v14  ;;  %v1300_v59 = vadd.f32 %v1299_v44, %v1298_v61  ;;  %v1271_v50 = vrot.slane %v1270_v21, 2  ;;  %v1284_v5 = vadd.f32 %v1283_v37, %v1282_v51 }
 0x446   : > { %v1278_v12 = vrot.slane %v1277_v36, 2  ;;  %v1262_v55 = vrot.slane %v1261_v6, 4 }
 0x447   : > { %v1294_v46 = vrot.slane %v1293_v19, 1  ;;  %v1301_v49 = vrot.slane %v1300_v59, 1  ;;  %v1272_v53 = vadd.f32 %v1271_v50, %v1270_v21  ;;  %v1285_v56 = vrot.slane %v1284_v5, 2 }
 0x448   : > { %v1279_v62 = vadd.f32 %v1278_v12, %v1277_v36  ;;  %v1263_v60 = vadd.f32 %v1262_v55, %v1261_v6 }
 0x449   : > { %v1295_v48 = vadd.f32 %v1294_v46, %v1293_v19  ;;  %v1302_v9 = vadd.f32 %v1301_v49, %v1300_v59  ;;  %v1273_v54 = vrot.slane %v1272_v53, 1  ;;  %v1286_v63 = vadd.f32 %v1285_v56, %v1284_v5 }
 0x44a   : > { %v1280_v7 = vrot.slane %v1279_v62, 1  ;;  %v1264_v10 = vrot.slane %v1263_v60, 2 }
 0x44b   : > { %1311 = vadd.xlane.f32.xlu2 %v1295_v48  ;;  %v1274_v20 = vadd.f32 %v1273_v54, %v1272_v53  ;;  %v1287_v23 = vrot.slane %v1286_v63, 1 }
 0x44c   : > { %v1281_v15 = vadd.f32 %v1280_v7, %v1279_v62  ;;  %v1265_v58 = vadd.f32 %v1264_v10, %v1263_v60 }
 0x44d   : > { %v1288_v45 = vadd.f32 %v1287_v23, %v1286_v63 }
 0x44e   : > { %v1266_v28 = vrot.slane %v1265_v58, 1 }
 0x450   : > { %v1267_v40 = vadd.f32 %v1266_v28, %v1265_v58 }
 0x453   : > { %1313 = vadd.xlane.f32.xlu2 %v1302_v9 }
 0x45b   : > { %1305 = vadd.xlane.f32.xlu2 %v1274_v20 }
 0x463   : > { %1307 = vadd.xlane.f32.xlu2 %v1281_v15 }
 0x466   : > { %1309 = vadd.xlane.f32.xlu1 %v1288_v45 }
 0x46b   : > { %s2634_s17 = spop %1833 }
 0x46c   : > { %1303 = vadd.xlane.f32.xlu0 %v1267_v40 }
 0x47b   : > { %1395 = vperm.xlu2 %1917, %v1762_v25  }
 0x47f   : > { %1400 = vperm.xlu1 %1918, %v1763_v31  }
 0x480   : > { %1429 = vperm.xlu0 %1919, %v1765_v32  }
 0x483   : > { %1424 = vperm.xlu2 %1917, %v1764_v33  }
 0x48b   : > { %1446 = vperm.xlu2 %1917, %v1766_v4  }
 0x493   : > { %1451 = vperm.xlu2 %1917, %v1767_v38  }
 0x4ac   : > { %v1385_v0 = vpop.permute.xlu0 %1384 }
 0x4ad   : > { %1835 = vpush %v1385_v0 }
 0x4ae   : > { %1837 = vpush %v1407_v35  ;;  %v1438_v61 = vpop.permute.xlu1 %1437 }
 0x4b4   : > { %v1414_v14 = vpop.permute.xlu0 %1413 }
 0x4b5   : > { %1839 = vpush %v1414_v14 }
 0x4b6   : > { %1841 = vpush %v1438_v61 }
 0x4be   : > { %v1312_v3 = vpop.xlane.xlu2 %1311 }
 0x4bf   : > { %v1316_v57 = vadd.f32 1e-05, %v1312_v3 }
 0x4c1   : > { %v1344_v36 = vand.u32 2147483648, %v1316_v57  ;;  %vm1338_vm3 = vweird.f32 %v1316_v57  ;;  %v1342_v6 = vand.u32 2147483647, %v1316_v57 }
 0x4c3   : > { %v1345_v62 = vor.u32 1.1754944e-38, %v1344_v36  ;;  %vm1343_vm6 = vcmp.eq.f32.partialorder %v1342_v6, 8.507059e+37 }
 0x4c6   : > { %v1314_v43 = vpop.xlane.xlu2 %1313 }
 0x4c7   : > { %v1317_v22 = vadd.f32 1e-05, %v1314_v43 }
 0x4c9   : > { %1920 = vrcp.f32 %v1317_v22  ;;  %v1359_v29 = vand.u32 2147483648, %v1317_v22  ;;  %vm1353_vm0 = vweird.f32 %v1317_v22  ;;  %v1357_v9 = vand.u32 2147483647, %v1317_v22 }
 0x4ca   : > { %1922 = vrcp.f32 %v1316_v57 }
 0x4cb   : > { %v1360_v54 = vor.u32 1.1754944e-38, %v1359_v29  ;;  %vm1358_vm5 = vcmp.eq.f32.partialorder %v1357_v9, 8.507059e+37 }
 0x4ce   : > { %v1306_v44 = vpop.xlane.xlu2 %1305 }
 0x4cf   : > { %v1921_v19 = vpop.eup %1920 }
 0x4d0   : > { %v1923_v46 = vpop.eup %1922  ;;  %v1349_v59 = vmul.f32 %v1921_v19, %v1317_v22  ;;  %vm1354_vm15 = vweird.f32 %v1921_v19 }
 0x4d1   : > { %v1334_v21 = vmul.f32 %v1923_v46, %v1316_v57  ;;  %vm1339_vm1 = vweird.f32 %v1923_v46  ;;  %vm1355_vm2 = vmor %vm1353_vm0, %vm1354_vm15  ;;  %v1380_v57 = vstv %s2634_s17 }
 0x4d2   : > { %v1350_v8 = vsub.f32 1.0, %v1349_v59  ;;  %vm1340_vm4 = vmor %vm1338_vm3, %vm1339_vm1 }
 0x4d3   : > { %v1335_v49 = vsub.f32 1.0, %v1334_v21 }
 0x4d4   : > { %v1351_v1 = vmul.f32 %v1921_v19, %v1350_v8 }
 0x4d5   : > { %v1336_v30 = vmul.f32 %v1923_v46, %v1335_v49 }
 0x4d6   : > { %v1308_v48 = vpop.xlane.xlu2 %1307  ;;  %v1352_v51 = vadd.f32 %v1921_v19, %v1351_v1 }
 0x4d7   : > { %v1337_v53 = vadd.f32 %v1923_v46, %v1336_v30 }
 0x4d8   : > { %v1356_v37 = vsel %vm1355_vm2, %v1921_v19, %v1352_v51 }
 0x4d9   : > { %v1310_v35 = vpop.xlane.xlu1 %1309  ;;  %v1341_v5 = vsel %vm1340_vm4, %v1923_v46, %v1337_v53  ;;  %v1361_v55 = vsel %vm1358_vm5, %v1360_v54, %v1356_v37 }
 0x4da   : > { %v1315_v50 = vadd.f32 1e-05, %v1310_v35  ;;  %v1346_v7 = vsel %vm1343_vm6, %v1345_v62, %v1341_v5  ;;  %v1362_v63 = vmul.f32 %v1361_v55, %v1308_v48 }
 0x4db   : > { %v1347_v58 = vmul.f32 %v1346_v7, %v1306_v44 }
 0x4dc   : > { %1924 = vrcp.f32 %v1315_v50  ;;  %v1329_v10 = vand.u32 2147483648, %v1315_v50  ;;  %v1327_v23 = vand.u32 2147483647, %v1315_v50  ;;  %vm1323_vm8 = vweird.f32 %v1315_v50 }
 0x4dd   : > { %v1367_v40 = vsub.f32 %v2564_v47, %v1362_v63  ;;  %v1365_v0 = vsub.f32 %v2550_v13, %v1347_v58  ;;  %v1366_v43 = vsub.f32 %v2553_v39, %v1347_v58 }
 0x4de   : > { %v2632_v52 = vpop.permute.xlu2 %1395  ;;  %s2636_s20 = spop %1835  ;;  %v1330_v25 = vor.u32 1.1754944e-38, %v1329_v10  ;;  %vm1328_vm10 = vcmp.eq.f32.partialorder %v1327_v23, 8.507059e+37 }
 0x4df   : > { %s2638_s21 = spop %1837  ;;  %v1304_v31 = vpop.xlane.xlu0 %1303  ;;  %v1387_v33 = vstv %s2636_s20 }
 0x4e0   : > { %v1409_v22 = vstv %s2638_s21  ;;  %v1389_v19 = vmul.f32 %v1387_v33, %v1365_v0  ;;  %v1390_v59 = vmul.f32 %v1387_v33, %v1366_v43 }
 0x4e2   : > { %v1925_v12 = vpop.eup %1924 }
 0x4e3   : > { %v1319_v20 = vmul.f32 %v1925_v12, %v1315_v50  ;;  %vm1324_vm7 = vweird.f32 %v1925_v12  ;;  %v1368_v50 = vsub.f32 %v2567_v34, %v1362_v63 }
 0x4e4   : > { %vm1325_vm9 = vmor %vm1323_vm8, %vm1324_vm7 }
 0x4e5   : > { %v1320_v56 = vsub.f32 1.0, %v1319_v20 }
 0x4e6   : > { %v1425_v60 = vpop.permute.xlu2 %1424  ;;  %s2640_s26 = spop %1839 }
 0x4e7   : > { %v1321_v15 = vmul.f32 %v1925_v12, %v1320_v56  ;;  %s2642_s13 = spop %1841  ;;  %v1416_v61 = vstv %s2640_s26 }
 0x4e8   : > { %v1440_v28 = vstv %s2642_s13  ;;  %v1418_v21 = vmul.f32 %v1416_v61, %v1365_v0  ;;  %v1419_v8 = vmul.f32 %v1416_v61, %v1366_v43 }
 0x4e9   : > { %v1322_v45 = vadd.f32 %v1925_v12, %v1321_v15  ;;  %v1442_v38 = vmul.f32 %v1440_v28, %v1367_v40 }
 0x4eb   : > { %v1326_v32 = vsel %vm1325_vm9, %v1925_v12, %v1322_v45 }
 0x4ec   : > { %v1331_v4 = vsel %vm1328_vm10, %v1330_v25, %v1326_v32 }
 0x4ed   : > { %v1332_v14 = vmul.f32 %v1331_v4, %v1304_v31 }
 0x4ee   : > { %v1447_v3 = vpop.permute.xlu2 %1446 }
 0x4ef   : > { %v1454_v44 = vadd.f32 %v1447_v3, %v1442_v38  ;;  %v1363_v47 = vsub.f32 %v2598_v2, %v1332_v14  ;;  %v1364_v46 = vsub.f32 %v2601_v41, %v1332_v14  ;;  %v1443_v2 = vmul.f32 %v1440_v28, %v1368_v50 }
 0x4f1   : > { %v1456_v48 = vmul.f32 %v1454_v44, %v2583_v42  ;;  %v1382_v49 = vmul.f32 %v1380_v57, %v1363_v47  ;;  %v1411_v13 = vmul.f32 %v1409_v22, %v1363_v47  ;;  %v1412_v1 = vmul.f32 %v1409_v22, %v1364_v46  ;;  %v1401_v39 = vpop.permute.xlu1 %1400 }
 0x4f2   : > { %v1383_v35 = vmul.f32 %v1380_v57, %v1364_v46  ;;  %v1430_v30 = vpop.permute.xlu0 %1429 }
 0x4f3   : > { %v1391_v51 = vadd.f32 %v1389_v19, %v1382_v49  ;;  %v1420_v29 = vadd.f32 %v1418_v21, %v1411_v13  ;;  %v1421_v53 = vadd.f32 %v1419_v8, %v1412_v1 }
 0x4f4   : > { %v1392_v9 = vadd.f32 %v1390_v59, %v1383_v35 }
 0x4f5   : > { %v1403_v41 = vadd.f32 %v2632_v52, %v1391_v51  ;;  %v1432_v36 = vadd.f32 %v1425_v60, %v1420_v29  ;;  %v1433_v6 = vadd.f32 %v1430_v30, %v1421_v53  ;;  %1460 = sbr.rel (%p1768_p3) target bundleno = 1419 (0x58b), region = 64 }
 0x4f6   : > { %v1404_v37 = vadd.f32 %v1401_v39, %v1392_v9  ;;  %v1452_v54 = vpop.permute.xlu2 %1451 }
 0x4f7   : > { %v1455_v42 = vadd.f32 %v1452_v54, %v1443_v2  ;;  %v1405_v12 = vmul.f32 %v1403_v41, %v2613_v27  ;;  %v1434_v5 = vmul.f32 %v1432_v36, %v2572_v16  ;;  %v1435_v55 = vmul.f32 %v1433_v6, %v2575_v24 }
 0x4f8   : > { %v1406_v34 = vmul.f32 %v1404_v37, %v2616_v11 }
 0x4f9   : > { %v1457_v20 = vmul.f32 %v1455_v42, %v2586_v26 }
 0x4fa   : > { %vm1461_vm11 = vcmask 130048   ;;  %1508 = vmatpush.msra.mxu1 %v1435_v55  ;;  %1799 = vmatpush.msra.mxu3 %v1406_v34 }
 0x4fb   : > { %1534 = vmatpush.msra.mxu2 %v1457_v20  ;;  %1482 = vmatpush.msra.mxu0 %v1406_v34 }
 0x4fc   : > { %1509 = vmatpush.msra.mxu1 %v1434_v5  ;;  %1800 = vmatpush.msra.mxu3 %v1405_v12 }
 0x4fd   : > { %1535 = vmatpush.msra.mxu2 %v1456_v48  ;;  %1773 = vmatmul.msk.f32.vlgmr.msra.gmra.mxu1 %vm1461_vm11, %v2211_v17 }
 0x4fe   : > { %1777 = vmatmul.msk.f32.vlgmr.msra.gmra.mxu2 %vm1461_vm11, %v2211_v17  ;;  %1483 = vmatpush.msra.mxu0 %v1405_v12 }
 0x4ff   : > { %1770 = vmatmul.msk.f32.vlgmr.msra.gmra.mxu3 %vm1461_vm11, %v2216_v18  ;;  %1769 = vmatmul.msk.f32.vlgmr.msra.gmra.mxu0 %vm1461_vm11, %v2211_v17 }
 0x505   : > { %1774 = vmatmul.msk.f32.gmra.mxu1 %vm1461_vm11, %v2216_v18 }
 0x506   : > { %1778 = vmatmul.msk.f32.gmra.mxu2 %vm1461_vm11, %v2216_v18 }
 0x57a   : > { %v1511_v16 = vpop.f32.mrf.mxu1 }
 0x57b   : > { %1775 = vst [vmem:[%s2252_s15 + $0xa0] sm:$0xff] %v1511_v16 }
 0x57c   : > { %v1485_v24 = vpop.f32.mrf.mxu0 }
 0x57d   : > { %1771 = vst [vmem:[%s2252_s15 + $0x90] sm:$0xff] %v1485_v24 }
 0x581   : > { %v1537_v26 = vpop.f32.mrf.mxu2 }
 0x582   : > { %1779 = vst [vmem:[%s2252_s15 + $0xb0] sm:$0xff] %v1537_v26  ;;  %v1488_v27 = vpop.f32.mrf.mxu3  ;;  %v1514_v11 = vpop.f32.mrf.mxu1 }
 0x583   : > { %1772 = vst [vmem:[%s2252_s15 + $0x98] sm:$0xff] %v1488_v27 }
 0x584   : > { %1776 = vst [vmem:[%s2252_s15 + $0xa8] sm:$0xff] %v1514_v11 }
 0x589   : > { %v1540_v52 = vpop.f32.mrf.mxu2 }
 0x58a   : > { %1780 = vst [vmem:[%s2252_s15 + $0xb8] sm:$0xff] %v1540_v52 }
 0x58b PF: > { %p1781_p4 = scmp.ne.s32.totalorder %s2590_s8, 0 }
 0x58d   : > { %1549 = sbr.rel (%p1781_p4) target bundleno = 1432 (0x598), region = 68 }
 0x592   : > { %1782 = vst [vmem:[%s2252_s15 + $0x90] sm:$0xff] %v1405_v12 }
 0x593   : > { %1783 = vst [vmem:[%s2252_s15 + $0x98] sm:$0xff] %v1406_v34 }
 0x594   : > { %1784 = vst [vmem:[%s2252_s15 + $0xa0] sm:$0xff] %v1434_v5 }
 0x595   : > { %1785 = vst [vmem:[%s2252_s15 + $0xa8] sm:$0xff] %v1435_v55 }
 0x596   : > { %1786 = vst [vmem:[%s2252_s15 + $0xb0] sm:$0xff] %v1456_v48 }
 0x597   : > { %1787 = vst [vmem:[%s2252_s15 + $0xb8] sm:$0xff] %v1457_v20 }
 0x598 PF: > { %s1843_s28 = smul.u32 192, %s2065_s0  ;;  %s1573_s29 = sshll.u32 %s2252_s15, 4  ;;  %s1574_s29 = int_to_ptr.vmem [resolvable:$true] %s1573_s29 }
 0x599   : > { %s1560_s16 = scalar_lea.sflag [#allocation5], %s234_s10  ;;  %s1958_s0 = scalar_lea.hbm %s2721_s5, 384 }
 0x59a   : > { %s1572_s12 = scalar_lea.hbm %s2721_s5, %s1843_s28 }
 0x59b   : > { %s1575_s14 = sshll.u32 %s1572_s12, 4  ;;  %s1576_s14 = int_to_ptr.hbm [resolvable:$true] %s1575_s14 }
 0x59c   : > { %s1952_s18 = sshra.s32 %s1576_s14, 4  ;;  %s1953_s18 = int_to_ptr.hbm [resolvable:$true] %s1952_s18 }
 0x59d   : > { %s1954_s19 = scalar_lea.hbm %s1953_s18, 192  ;;  %p1959_p10 = scmp.lt.s32.totalorder %s1953_s18, %s2721_s5 }
 0x59e   : > { %p1955_p7 = scmp.ne.s32.totalorder %s1953_s18, %s1954_s19  ;;  %p1960_p11 = scmp.lt.s32.totalorder %s1958_s0, %s1954_s19 }
 0x5a0   : > { %p1956_p8 = pnand %p1955_p7, %p2082_p5  ;;  %p1961_p12 = por %p1960_p11, %p1959_p10 }
 0x5a2   : > { %p1957_p9 = pneg %p1956_p8 }
 0x5a4   : > { %p1962_p13 = pnand %p1961_p12, %p1957_p9 }
 0x5a6   : > { %1965 = shalt.err (!%p1962_p13)
}
 0x5a7   : > { %s2009_s10 = smov 128   ;;  %s2010_s21 = smov 8  }
 0x5a8   : > { %1844 = dma.vmem_to_hbm [thread:$0]  (%p2082_p5), %s1574_s29, 3072, %s1576_s14, %s1560_s16, %s2009_s10, %s2009_s10, %s2010_s21  }
 0x5a9 PF: > { %p1850_p0 = scmp.ge.s32.totalorder %s2002_s25, 2  ;;  %s1590_s26 = sand.u32 1, %s1990_s22  }
 0x5aa   : > { %s1591_s13 = scalar_lea.sflag [#allocation5], %s1590_s26 }
 0x5ab   : > { %p1847_p1 = pnand %p1850_p0, %p2086_p6 }
 0x5ad   : > { %p1848_p2 = pneg %p1847_p1 }
 0x5af   : > { %1985 = dma.done.wait (%p1848_p2), %s1591_s13, 3072  }
 0x5b0   : > { %1987 = vsyncadd (%p1848_p2), %s1591_s13, 4294964224  ;;  %p23_p3 = scmp.ge.s32.totalorder %s2069_s27, 4   ;;  %s2724_s22 = smov %s1994_s23 }
 0x5b1   : > { %s2725_s23 = smov %s1998_s24  ;;  %s2726_s24 = smov %s2080_s30 }
 0x5b2   : > { %s2727_s25 = smov %s2069_s27  ;;  %25 = sbr.rel (!%p23_p3) target bundleno = 9 (0x9), region = 140 }
 0x5b7   :  { %1597 = vsyncpa [#allocation5], 1 }
 0x5b8   :  { %1599 = vsyncpa [#allocation5 + $0x1], 1 }

</bundles_post_ra>
